<compile_context>
chip_gen: v5e
topology: v5e:2x2
jax: 0.10.0
libtpu: 0.0.40
codegen_flags: <defaults>
</compile_context>

<pallas_src>
import functools

import jax
import jax.numpy as jnp
from jax.experimental import pallas as pl
from jax.experimental.pallas import tpu as pltpu


def double_q_kernel(state_ref, action_ref,
                    w1s_ref, w1a_ref, w23_ref, w4_ref, b_ref,
                    q_ref, *, precision):
    """Fused twin-MLP forward: one (batch_tile, 2) output per grid step."""
    H = w23_ref.shape[-1]
    cdt = w23_ref.dtype          # MXU input dtype (bf16 fast path / f32 parity)
    dot = functools.partial(jnp.dot, preferred_element_type=jnp.float32,
                            precision=precision)

    s = state_ref[...].astype(cdt)
    a = action_ref[...].astype(cdt)

    # Layer 1: both networks fused along the output axis -> (B, 2H), f32 accum.
    h1 = jnp.maximum(
        dot(s, w1s_ref[...]) + dot(a, w1a_ref[...]) + b_ref[:, 0:2 * H], 0.0)
    # Lane-aligned value slices (H is a multiple of 128 for the default 256);
    # no data movement, just vreg selection.
    h1_1 = h1[:, :H].astype(cdt)
    h1_2 = h1[:, H:].astype(cdt)

    # Layers 2 and 3: two independent (B, H) streams - no (B, 2H) concat traffic.
    h2_1 = jnp.maximum(dot(h1_1, w23_ref[0]) + b_ref[:, 2 * H:3 * H], 0.0).astype(cdt)
    h2_2 = jnp.maximum(dot(h1_2, w23_ref[1]) + b_ref[:, 3 * H:4 * H], 0.0).astype(cdt)
    h3_1 = jnp.maximum(dot(h2_1, w23_ref[2]) + b_ref[:, 4 * H:5 * H], 0.0).astype(cdt)
    h3_2 = jnp.maximum(dot(h2_2, w23_ref[3]) + b_ref[:, 5 * H:6 * H], 0.0).astype(cdt)

    # Final layer: zero-padded (H, 2) weights per stream, so the two streams sum
    # directly into a single lane-packed (B, 2) output (column 0 = q1, 1 = q2).
    q = dot(h3_1, w4_ref[0]) + dot(h3_2, w4_ref[1]) + b_ref[:, 6 * H:6 * H + 2]
    q_ref[...] = q.astype(q_ref.dtype)


def pack_double_q_params(params, state_dim, *, weight_dtype=jnp.bfloat16):
    """Repack per-layer nn.Linear params into the fused kernel layout.

    Done once, outside jit.  Weights are stored in `weight_dtype` (bf16 by
    default: halves the HBM->VMEM weight DMA and feeds the MXU natively);
    biases stay in f32 since they add into the f32 accumulators.
    """
    (w1_1, b1_1, w2_1, b2_1, w3_1, b3_1, w4_1, b4_1,
     w1_2, b1_2, w2_2, b2_2, w3_2, b3_2, w4_2, b4_2) = params
    H = w1_1.shape[1]

    w1 = jnp.concatenate([w1_1, w1_2], axis=1)            # (D, 2H)
    w1s = w1[:state_dim].astype(weight_dtype)              # (state_dim, 2H)
    w1a = w1[state_dim:].astype(weight_dtype)              # (action_dim, 2H)

    w23 = jnp.stack([w2_1, w2_2, w3_1, w3_2], axis=0).astype(weight_dtype)  # (4,H,H)

    # Per-stream final weights, zero-padded to (H, 2) so the kernel gets a
    # lane-packed (B, 2) result with no concatenate.
    w4 = jnp.zeros((2, H, 2), jnp.float32)
    w4 = w4.at[0, :, 0:1].set(w4_1).at[1, :, 1:2].set(w4_2)
    w4 = w4.astype(weight_dtype)                            # (2, H, 2)

    biases = jnp.concatenate(
        [b1_1, b1_2, b2_1, b2_2, b3_1, b3_2, b4_1, b4_2],
        axis=1).astype(jnp.float32)                         # (1, 6H+2)

    return (w1s, w1a, w23, w4, biases)


def _full_spec(arr):
    nd = arr.ndim
    return pl.BlockSpec(arr.shape, lambda i, _n=nd: (0,) * _n)


def double_q_forward(state, action, packed, *, precision=None, batch_tile=None):
    """Fused DoubleQFunc forward.  Returns (q1, q2), each (B, 1)."""
    B, SD = state.shape
    AD = action.shape[1]
    w1s, w1a, w23, w4, biases = packed
    H = w23.shape[-1]   # NOTE: H % 128 == 0 keeps in-kernel slices lane-aligned
                        # (other H remain correct, just slower).

    if isinstance(precision, str):
        precision = {"default": None,
                     "high": jax.lax.Precision.HIGH,
                     "highest": jax.lax.Precision.HIGHEST}[precision.lower()]

    # Grid policy:
    #   B <= 128          -> single step, all-resident (latency path).
    #   128 < B <= 1024   -> 2 steps so v7x megacore can shard both TCs.
    #   B > 1024          -> 512-row tiles (amortizes ~0.35us/step overhead).
    if batch_tile is None:
        if B <= 128:
            batch_tile = B
        elif B <= 1024:
            batch_tile = ((pl.cdiv(B, 2) + 7) // 8) * 8
        else:
            batch_tile = 512
    batch_tile = min(batch_tile, B)
    if batch_tile < B:
        batch_tile = ((batch_tile + 7) // 8) * 8   # (8,128) sublane constraint
    nb = pl.cdiv(B, batch_tile)   # no padding: Pallas masks the partial block

    in_specs = [
        pl.BlockSpec((batch_tile, SD), lambda i: (i, 0)),
        pl.BlockSpec((batch_tile, AD), lambda i: (i, 0)),
        _full_spec(w1s), _full_spec(w1a), _full_spec(w23),
        _full_spec(w4), _full_spec(biases),
    ]
    out_spec = pl.BlockSpec((batch_tile, 2), lambda i: (i, 0))

    q = pl.pallas_call(
        functools.partial(double_q_kernel, precision=precision),
        out_shape=jax.ShapeDtypeStruct((B, 2), state.dtype),
        grid_spec=pltpu.PrefetchScalarGridSpec(
            num_scalar_prefetch=0,
            grid=(nb,),
            in_specs=in_specs,
            out_specs=out_spec,
        ),
        compiler_params=pltpu.CompilerParams(
            dimension_semantics=("parallel",)),
    )(state, action, w1s, w1a, w23, w4, biases)

    return q[:, 0:1], q[:, 1:2]


def init_double_q_params(key, state_dim, action_dim, hidden_size):
    """Deterministic init mimicking nn.Linear's U(-1/sqrt(fan_in), +...)."""
    in_dim = state_dim + action_dim

    def linear(key, fan_in, fan_out):
        kw, kb = jax.random.split(key)
        bound = 1.0 / jnp.sqrt(jnp.float32(fan_in))
        w = jax.random.uniform(kw, (fan_in, fan_out), jnp.float32, -bound, bound)
        b = jax.random.uniform(kb, (1, fan_out), jnp.float32, -bound, bound)
        return w, b

    keys = jax.random.split(key, 8)
    params = []
    for net in range(2):
        k0, k1, k2, k3 = keys[4 * net: 4 * net + 4]
        w1, b1 = linear(k0, in_dim, hidden_size)
        w2, b2 = linear(k1, hidden_size, hidden_size)
        w3, b3 = linear(k2, hidden_size, hidden_size)
        w4, b4 = linear(k3, hidden_size, 1)
        params += [w1, b1, w2, b2, w3, b3, w4, b4]
    return tuple(params)


def double_q_reference(state, action, params):
    """Pure-JAX reference (unfused layout, fp32 HIGHEST) for correctness."""
    x = jnp.concatenate([state, action], axis=1)
    (w1_1, b1_1, w2_1, b2_1, w3_1, b3_1, w4_1, b4_1,
     w1_2, b1_2, w2_2, b2_2, w3_2, b3_2, w4_2, b4_2) = params

    dot = functools.partial(jnp.dot, precision=jax.lax.Precision.HIGHEST)

    def mlp(x, w1, b1, w2, b2, w3, b3, w4, b4):
        h = jnp.maximum(dot(x, w1) + b1, 0.0)
        h = jnp.maximum(dot(h, w2) + b2, 0.0)
        h = jnp.maximum(dot(h, w3) + b3, 0.0)
        return dot(h, w4) + b4

    return (mlp(x, w1_1, b1_1, w2_1, b2_1, w3_1, b3_1, w4_1, b4_1),
            mlp(x, w1_2, b1_2, w2_2, b2_2, w3_2, b3_2, w4_2, b4_2))


if __name__ == "__main__":
    # SAC-style flat state/action vectors; hidden_size matches the module
    # default (256), batch kept small.
    B, STATE_DIM, ACTION_DIM, HIDDEN = 16, 12, 4, 256

    key = jax.random.PRNGKey(0)
    k_state, k_action, k_params = jax.random.split(key, 3)

    state = jax.random.normal(k_state, (B, STATE_DIM), jnp.float32)
    action = jax.random.normal(k_action, (B, ACTION_DIM), jnp.float32)
    params = init_double_q_params(k_params, STATE_DIM, ACTION_DIM, HIDDEN)

    q1_ref, q2_ref = double_q_reference(state, action, params)

    # --- Fast path (default): bf16 weights + bf16 MXU inputs, f32 accumulate.
    packed_fast = jax.tree_util.tree_map(
        jax.device_put, pack_double_q_params(params, STATE_DIM,
                                             weight_dtype=jnp.bfloat16))
    fwd_fast = jax.jit(functools.partial(double_q_forward, precision="default"))
    q1, q2 = fwd_fast(state, action, packed_fast)
    jax.block_until_ready((q1, q2))

    assert q1.shape == (B, 1) and q2.shape == (B, 1)
    assert jnp.allclose(q1, q1_ref, atol=5e-2, rtol=5e-2)
    assert jnp.allclose(q2, q2_ref, atol=5e-2, rtol=5e-2)

    # --- Parity path: f32 weights + Precision.HIGHEST for fp32 bit-level checks.
    packed_hi = jax.tree_util.tree_map(
        jax.device_put, pack_double_q_params(params, STATE_DIM,
                                             weight_dtype=jnp.float32))
    fwd_hi = jax.jit(functools.partial(double_q_forward, precision="highest"))
    q1h, q2h = fwd_hi(state, action, packed_hi)
    jax.block_until_ready((q1h, q2h))

    assert jnp.allclose(q1h, q1_ref, atol=1e-5, rtol=1e-5)
    assert jnp.allclose(q2h, q2_ref, atol=1e-5, rtol=1e-5)

    print("KERNEL_OK")
</pallas_src>

<mosaic_0001>
module attributes {stable_mosaic.version = 11 : i64} {
  func.func @double_q_kernel(%arg0: i32, %arg1: memref<16x12xf32, #tpu.memory_space<vmem>>, %arg2: memref<16x4xf32, #tpu.memory_space<vmem>>, %arg3: memref<12x512xbf16, #tpu.memory_space<vmem>>, %arg4: memref<4x512xbf16, #tpu.memory_space<vmem>>, %arg5: memref<4x256x256xbf16, #tpu.memory_space<vmem>>, %arg6: memref<2x256x2xbf16, #tpu.memory_space<vmem>>, %arg7: memref<1x1538xf32, #tpu.memory_space<vmem>>, %arg8: memref<16x2xf32, #tpu.memory_space<vmem>>) attributes {dimension_semantics = [#tpu.dimension_semantics<parallel>], iteration_bounds = array<i64: 1>, scalar_prefetch = 0 : i64, scratch_operands = 0 : i64, tpu.core_type = #tpu.core_type<tc>, window_params = [{transform_indices = @transform_0, window_bounds = array<i64: 16, 12>}, {transform_indices = @transform_1, window_bounds = array<i64: 16, 4>}, {pipeline_mode = #tpu.pipeline_mode<synchronous>, transform_indices = @transform_2, window_bounds = array<i64: 12, 512>}, {pipeline_mode = #tpu.pipeline_mode<synchronous>, transform_indices = @transform_3, window_bounds = array<i64: 4, 512>}, {pipeline_mode = #tpu.pipeline_mode<synchronous>, transform_indices = @transform_4, window_bounds = array<i64: 4, 256, 256>}, {pipeline_mode = #tpu.pipeline_mode<synchronous>, transform_indices = @transform_5, window_bounds = array<i64: 2, 256, 2>}, {pipeline_mode = #tpu.pipeline_mode<synchronous>, transform_indices = @transform_6, window_bounds = array<i64: 1, 1538>}, {transform_indices = @transform_7, window_bounds = array<i64: 16, 2>}]} {
    %c0 = arith.constant 0 : index
    %c0_0 = arith.constant 0 : index
    %0 = vector.load %arg1[%c0, %c0_0] : memref<16x12xf32, #tpu.memory_space<vmem>>, vector<16x12xf32>
    %1 = arith.truncf %0 : vector<16x12xf32> to vector<16x12xbf16>
    %c0_1 = arith.constant 0 : index
    %c0_2 = arith.constant 0 : index
    %2 = vector.load %arg2[%c0_1, %c0_2] : memref<16x4xf32, #tpu.memory_space<vmem>>, vector<16x4xf32>
    %3 = arith.truncf %2 : vector<16x4xf32> to vector<16x4xbf16>
    %c0_3 = arith.constant 0 : index
    %c0_4 = arith.constant 0 : index
    %4 = vector.load %arg3[%c0_3, %c0_4] : memref<12x512xbf16, #tpu.memory_space<vmem>>, vector<12x512xbf16>
    %cst = arith.constant dense<0.000000e+00> : vector<16x512xf32>
    %5 = tpu.matmul %1, %4, %cst {dimension_numbers = #tpu.dot_dimension_numbers<[1], [0], [0], [1], [0, 0, 1, 1], [], []>} : vector<16x12xbf16>, vector<12x512xbf16>, vector<16x512xf32> -> vector<16x512xf32>
    %c0_5 = arith.constant 0 : index
    %c0_6 = arith.constant 0 : index
    %6 = vector.load %arg4[%c0_5, %c0_6] : memref<4x512xbf16, #tpu.memory_space<vmem>>, vector<4x512xbf16>
    %cst_7 = arith.constant dense<0.000000e+00> : vector<16x512xf32>
    %7 = tpu.matmul %3, %6, %cst_7 {dimension_numbers = #tpu.dot_dimension_numbers<[1], [0], [0], [1], [0, 0, 1, 1], [], []>} : vector<16x4xbf16>, vector<4x512xbf16>, vector<16x512xf32> -> vector<16x512xf32>
    %8 = arith.addf %5, %7 : vector<16x512xf32>
    %c0_8 = arith.constant 0 : index
    %c0_9 = arith.constant 0 : index
    %9 = vector.load %arg7[%c0_8, %c0_9] : memref<1x1538xf32, #tpu.memory_space<vmem>>, vector<1x512xf32>
    %10 = vector.broadcast %9 : vector<1x512xf32> to vector<16x512xf32>
    %11 = arith.addf %8, %10 : vector<16x512xf32>
    %cst_10 = arith.constant 0.000000e+00 : f32
    %12 = vector.broadcast %cst_10 : f32 to vector<16x512xf32>
    %13 = arith.maximumf %11, %12 : vector<16x512xf32>
    %14 = vector.extract_strided_slice %13 {offsets = [0, 0], sizes = [16, 256], strides = [1, 1]} : vector<16x512xf32> to vector<16x256xf32>
    %15 = arith.truncf %14 : vector<16x256xf32> to vector<16x256xbf16>
    %16 = vector.extract_strided_slice %13 {offsets = [0, 256], sizes = [16, 256], strides = [1, 1]} : vector<16x512xf32> to vector<16x256xf32>
    %17 = arith.truncf %16 : vector<16x256xf32> to vector<16x256xbf16>
    %c0_11 = arith.constant 0 : index
    %c0_12 = arith.constant 0 : index
    %c0_13 = arith.constant 0 : index
    %18 = vector.load %arg5[%c0_11, %c0_12, %c0_13] : memref<4x256x256xbf16, #tpu.memory_space<vmem>>, vector<1x256x256xbf16>
    %19 = vector.shape_cast %18 : vector<1x256x256xbf16> to vector<256x256xbf16>
    %cst_14 = arith.constant dense<0.000000e+00> : vector<16x256xf32>
    %20 = tpu.matmul %15, %19, %cst_14 {dimension_numbers = #tpu.dot_dimension_numbers<[1], [0], [0], [1], [0, 0, 1, 1], [], []>} : vector<16x256xbf16>, vector<256x256xbf16>, vector<16x256xf32> -> vector<16x256xf32>
    %c0_15 = arith.constant 0 : index
    %c512 = arith.constant 512 : index
    %21 = vector.load %arg7[%c0_15, %c512] : memref<1x1538xf32, #tpu.memory_space<vmem>>, vector<1x256xf32>
    %22 = vector.broadcast %21 : vector<1x256xf32> to vector<16x256xf32>
    %23 = arith.addf %20, %22 : vector<16x256xf32>
    %cst_16 = arith.constant 0.000000e+00 : f32
    %24 = vector.broadcast %cst_16 : f32 to vector<16x256xf32>
    %25 = arith.maximumf %23, %24 : vector<16x256xf32>
    %26 = arith.truncf %25 : vector<16x256xf32> to vector<16x256xbf16>
    %c1 = arith.constant 1 : index
    %c0_17 = arith.constant 0 : index
    %c0_18 = arith.constant 0 : index
    %27 = vector.load %arg5[%c1, %c0_17, %c0_18] : memref<4x256x256xbf16, #tpu.memory_space<vmem>>, vector<1x256x256xbf16>
    %28 = vector.shape_cast %27 : vector<1x256x256xbf16> to vector<256x256xbf16>
    %cst_19 = arith.constant dense<0.000000e+00> : vector<16x256xf32>
    %29 = tpu.matmul %17, %28, %cst_19 {dimension_numbers = #tpu.dot_dimension_numbers<[1], [0], [0], [1], [0, 0, 1, 1], [], []>} : vector<16x256xbf16>, vector<256x256xbf16>, vector<16x256xf32> -> vector<16x256xf32>
    %c0_20 = arith.constant 0 : index
    %c768 = arith.constant 768 : index
    %30 = vector.load %arg7[%c0_20, %c768] : memref<1x1538xf32, #tpu.memory_space<vmem>>, vector<1x256xf32>
    %31 = vector.broadcast %30 : vector<1x256xf32> to vector<16x256xf32>
    %32 = arith.addf %29, %31 : vector<16x256xf32>
    %cst_21 = arith.constant 0.000000e+00 : f32
    %33 = vector.broadcast %cst_21 : f32 to vector<16x256xf32>
    %34 = arith.maximumf %32, %33 : vector<16x256xf32>
    %35 = arith.truncf %34 : vector<16x256xf32> to vector<16x256xbf16>
    %c2 = arith.constant 2 : index
    %c0_22 = arith.constant 0 : index
    %c0_23 = arith.constant 0 : index
    %36 = vector.load %arg5[%c2, %c0_22, %c0_23] : memref<4x256x256xbf16, #tpu.memory_space<vmem>>, vector<1x256x256xbf16>
    %37 = vector.shape_cast %36 : vector<1x256x256xbf16> to vector<256x256xbf16>
    %cst_24 = arith.constant dense<0.000000e+00> : vector<16x256xf32>
    %38 = tpu.matmul %26, %37, %cst_24 {dimension_numbers = #tpu.dot_dimension_numbers<[1], [0], [0], [1], [0, 0, 1, 1], [], []>} : vector<16x256xbf16>, vector<256x256xbf16>, vector<16x256xf32> -> vector<16x256xf32>
    %c0_25 = arith.constant 0 : index
    %c1024 = arith.constant 1024 : index
    %39 = vector.load %arg7[%c0_25, %c1024] : memref<1x1538xf32, #tpu.memory_space<vmem>>, vector<1x256xf32>
    %40 = vector.broadcast %39 : vector<1x256xf32> to vector<16x256xf32>
    %41 = arith.addf %38, %40 : vector<16x256xf32>
    %cst_26 = arith.constant 0.000000e+00 : f32
    %42 = vector.broadcast %cst_26 : f32 to vector<16x256xf32>
    %43 = arith.maximumf %41, %42 : vector<16x256xf32>
    %44 = arith.truncf %43 : vector<16x256xf32> to vector<16x256xbf16>
    %c3 = arith.constant 3 : index
    %c0_27 = arith.constant 0 : index
    %c0_28 = arith.constant 0 : index
    %45 = vector.load %arg5[%c3, %c0_27, %c0_28] : memref<4x256x256xbf16, #tpu.memory_space<vmem>>, vector<1x256x256xbf16>
    %46 = vector.shape_cast %45 : vector<1x256x256xbf16> to vector<256x256xbf16>
    %cst_29 = arith.constant dense<0.000000e+00> : vector<16x256xf32>
    %47 = tpu.matmul %35, %46, %cst_29 {dimension_numbers = #tpu.dot_dimension_numbers<[1], [0], [0], [1], [0, 0, 1, 1], [], []>} : vector<16x256xbf16>, vector<256x256xbf16>, vector<16x256xf32> -> vector<16x256xf32>
    %c0_30 = arith.constant 0 : index
    %c1280 = arith.constant 1280 : index
    %48 = vector.load %arg7[%c0_30, %c1280] : memref<1x1538xf32, #tpu.memory_space<vmem>>, vector<1x256xf32>
    %49 = vector.broadcast %48 : vector<1x256xf32> to vector<16x256xf32>
    %50 = arith.addf %47, %49 : vector<16x256xf32>
    %cst_31 = arith.constant 0.000000e+00 : f32
    %51 = vector.broadcast %cst_31 : f32 to vector<16x256xf32>
    %52 = arith.maximumf %50, %51 : vector<16x256xf32>
    %53 = arith.truncf %52 : vector<16x256xf32> to vector<16x256xbf16>
    %c0_32 = arith.constant 0 : index
    %c0_33 = arith.constant 0 : index
    %c0_34 = arith.constant 0 : index
    %54 = vector.load %arg6[%c0_32, %c0_33, %c0_34] : memref<2x256x2xbf16, #tpu.memory_space<vmem>>, vector<1x256x2xbf16>
    %55 = vector.shape_cast %54 : vector<1x256x2xbf16> to vector<256x2xbf16>
    %cst_35 = arith.constant dense<0.000000e+00> : vector<16x2xf32>
    %56 = tpu.matmul %44, %55, %cst_35 {dimension_numbers = #tpu.dot_dimension_numbers<[1], [0], [0], [1], [0, 0, 1, 1], [], []>} : vector<16x256xbf16>, vector<256x2xbf16>, vector<16x2xf32> -> vector<16x2xf32>
    %c1_36 = arith.constant 1 : index
    %c0_37 = arith.constant 0 : index
    %c0_38 = arith.constant 0 : index
    %57 = vector.load %arg6[%c1_36, %c0_37, %c0_38] : memref<2x256x2xbf16, #tpu.memory_space<vmem>>, vector<1x256x2xbf16>
    %58 = vector.shape_cast %57 : vector<1x256x2xbf16> to vector<256x2xbf16>
    %cst_39 = arith.constant dense<0.000000e+00> : vector<16x2xf32>
    %59 = tpu.matmul %53, %58, %cst_39 {dimension_numbers = #tpu.dot_dimension_numbers<[1], [0], [0], [1], [0, 0, 1, 1], [], []>} : vector<16x256xbf16>, vector<256x2xbf16>, vector<16x2xf32> -> vector<16x2xf32>
    %60 = arith.addf %56, %59 : vector<16x2xf32>
    %c0_40 = arith.constant 0 : index
    %c1536 = arith.constant 1536 : index
    %61 = vector.load %arg7[%c0_40, %c1536] : memref<1x1538xf32, #tpu.memory_space<vmem>>, vector<1x2xf32>
    %62 = vector.broadcast %61 : vector<1x2xf32> to vector<16x2xf32>
    %63 = arith.addf %60, %62 : vector<16x2xf32>
    %c0_41 = arith.constant 0 : index
    %c0_42 = arith.constant 0 : index
    %64 = vector.load %arg8[%c0_41, %c0_42] : memref<16x2xf32, #tpu.memory_space<vmem>>, vector<16x2xf32>
    tpu.vector_store %arg8[%c0_41, %c0_42], %63 {strides = array<i32>} : memref<16x2xf32, #tpu.memory_space<vmem>>, vector<16x2xf32>,
    return
  }
  func.func @transform_0(%arg0: i32) -> (i32, i32) {
    %c0_i32 = arith.constant 0 : i32
    %c0_i32_0 = arith.constant 0 : i32
    return %arg0, %c0_i32 : i32, i32
  }
  func.func @transform_1(%arg0: i32) -> (i32, i32) {
    %c0_i32 = arith.constant 0 : i32
    %c0_i32_0 = arith.constant 0 : i32
    return %arg0, %c0_i32 : i32, i32
  }
  func.func @transform_2(%arg0: i32) -> (i32, i32) {
    %c0_i32 = arith.constant 0 : i32
    %c0_i32_0 = arith.constant 0 : i32
    %c0_i32_1 = arith.constant 0 : i32
    return %c0_i32, %c0_i32_0 : i32, i32
  }
  func.func @transform_3(%arg0: i32) -> (i32, i32) {
    %c0_i32 = arith.constant 0 : i32
    %c0_i32_0 = arith.constant 0 : i32
    %c0_i32_1 = arith.constant 0 : i32
    return %c0_i32, %c0_i32_0 : i32, i32
  }
  func.func @transform_4(%arg0: i32) -> (i32, i32, i32) {
    %c0_i32 = arith.constant 0 : i32
    %c0_i32_0 = arith.constant 0 : i32
    %c0_i32_1 = arith.constant 0 : i32
    %c0_i32_2 = arith.constant 0 : i32
    return %c0_i32, %c0_i32_0, %c0_i32_1 : i32, i32, i32
  }
  func.func @transform_5(%arg0: i32) -> (i32, i32, i32) {
    %c0_i32 = arith.constant 0 : i32
    %c0_i32_0 = arith.constant 0 : i32
    %c0_i32_1 = arith.constant 0 : i32
    %c0_i32_2 = arith.constant 0 : i32
    return %c0_i32, %c0_i32_0, %c0_i32_1 : i32, i32, i32
  }
  func.func @transform_6(%arg0: i32) -> (i32, i32) {
    %c0_i32 = arith.constant 0 : i32
    %c0_i32_0 = arith.constant 0 : i32
    %c0_i32_1 = arith.constant 0 : i32
    return %c0_i32, %c0_i32_0 : i32, i32
  }
  func.func @transform_7(%arg0: i32) -> (i32, i32) {
    %c0_i32 = arith.constant 0 : i32
    %c0_i32_0 = arith.constant 0 : i32
    return %arg0, %c0_i32 : i32, i32
  }
}

</mosaic_0001>

<bundles_post_ra>
// kernel: double_q_forward.1
= control target key start
LH: loop header
LB: loop body
LE: loop exit
PB: predicated region body
PF: predicated region fallthrough
CT: control target
= control target key end

     0   :  { %12 = vsyncpa [#allocation3], 0  ;;  %s2508_s27 = smov [#allocation2]   ;;  %s2509_s29 = smov 128   ;;  %s2749_s0 = inlined_call_operand.vmem [shape: f32[16,12], index: 0, kind: input, shape index: {}]   ;;  %s2750_s1 = inlined_call_operand.vmem [shape: f32[16,4], index: 1, kind: input, shape index: {}]   ;;  %s2751_s2 = inlined_call_operand.vmem [shape: bf16[12,512], index: 2, kind: input, shape index: {}]   ;;  %s2752_s3 = inlined_call_operand.vmem [shape: bf16[4,512], index: 3, kind: input, shape index: {}]   ;;  %s2753_s4 = inlined_call_operand.hbm [shape: bf16[4,256,256], index: 4, kind: input, shape index: {}]   ;;  %s2754_s5 = inlined_call_operand.vmem [shape: bf16[2,256,2], index: 5, kind: input, shape index: {}]   ;;  %s2755_s6 = inlined_call_operand.vmem [shape: f32[1,1538], index: 6, kind: input, shape index: {}]   ;;  %s2756_s7 = inlined_call_operand.vmem [shape: f32[16,2], index: 7, kind: output, shape index: {}]  }
   0x1   :  { %s25_s26 = sshll.u32 %s2753_s4, 4  ;;  %s27_s28 = sshll.u32 %s2508_s27, 4  ;;  %s26_s26 = int_to_ptr.hbm [resolvable:$true] %s25_s26  ;;  %s28_s28 = int_to_ptr.vmem [resolvable:$true] %s27_s28 }
   0x2   :  { %s2510_s30 = smov 8  }
   0x3   :  { %33 = dma.hbm_to_vmem [thread:$0]  %s26_s26, 16384, %s28_s28, [#allocation3], %s2509_s29, %s2509_s29, %s2510_s30  }
   0x4   :  { %2506 = dma.done.wait [#allocation3], 16384  }
   0x5   :  { %2507 = vsyncadd [#allocation3], 4294950912  ;;  %v53_v0 = vld [vmem:[%s2752_s3] sm:$0xff]  ;;  %v2316_v2 = vld [vmem:[%s2751_s2 + $0xc] sm:$0x30]  ;;  %vm149_vm0 = vcmask 1045504  }
   0x6   :  { %55 = vst [vmem:[#allocation1] ss:$4 sm:$0xff] %v53_v0  ;;  %v1624_v1 = vld [vmem:[%s2751_s2] sm:$0xf]  ;;  %v2314_v4 = vld [vmem:[%s2751_s2 + $0x4] sm:$0xf] }
   0x7   :  { %v1625_v3 = vor.u32 %v2316_v2, %v1624_v1  ;;  %v1626_v5 = vld [vmem:[%s2751_s2 + $0x10] sm:$0x30]  ;;  %v2315_v6 = vld [vmem:[%s2751_s2 + $0xc] sm:$0xf]  ;;  %v1634_v7 = vld [vmem:[%s2751_s2 + $0x18] sm:$0x30] }
   0x8   :  { %v1629_v8 = vor.u32 %v2314_v4, %v1626_v5  ;;  %v1632_v9 = vld [vmem:[%s2751_s2 + $0x8] sm:$0xf]  ;;  %v2317_v10 = vld [vmem:[%s2751_s2 + $0x14] sm:$0x30]  ;;  %vm64_vm1 = vcmask 1041408   ;;  %v46_v11 = vld [vmem:[%s2750_s1] sm:$0xff]  ;;  %v1637_v14 = vor.u32 %v2315_v6, %v1634_v7 }
   0x9   :  { %v47_v12 = vld [vmem:[%s2750_s1 + $0x8] sm:$0xff]  ;;  %vm60_vm2 = vcmask 31744   ;;  %v151_v13 = vsel %vm149_vm0, %v1625_v3, 0  ;;  %v1700_v15 = vld [vmem:[#allocation2 + $0x70] sm:$0xf]  ;;  %v1633_v21 = vor.u32 %v2317_v10, %v1632_v9  ;;  %v43_v0 = vld [vmem:[%s2749_s0] sm:$0xff] }
   0xa   :  { %v2333_v16 = vld [vmem:[#allocation2 + $0x74] sm:$0xf0]  ;;  %v1764_v17 = vld [vmem:[#allocation2 + $0xf0] sm:$0xf]  ;;  %v2332_v22 = vld [vmem:[#allocation2 + $0x74] sm:$0xf]  ;;  %v48_v28 = vpack.c.bf16 %v47_v12, %v46_v11 }
   0xb   :  { %v2349_v18 = vld [vmem:[#allocation2 + $0xf4] sm:$0xf0]  ;;  %v1702_v23 = vld [vmem:[#allocation2 + $0x78] sm:$0xf0]  ;;  %v2348_v24 = vld [vmem:[#allocation2 + $0xf4] sm:$0xf]  ;;  %v1701_v36 = vor.u32 %v2333_v16, %v1700_v15 }
   0xc   :  { %v154_v29 = vsel %vm149_vm0, %v1629_v8, 0  ;;  %v1766_v32 = vld [vmem:[#allocation2 + $0xf8] sm:$0xf0]  ;;  %v160_v34 = vsel %vm149_vm0, %v1637_v14, 0  ;;  %v157_v35 = vsel %vm149_vm0, %v1633_v21, 0  ;;  %v1765_v37 = vor.u32 %v2349_v18, %v1764_v17  ;;  %v44_v1 = vld [vmem:[%s2749_s0 + $0x8] sm:$0xff] }
   0xd   :  { %v56_v19 = vld.sshfl [vmem:[#allocation1] sm:$0xff pattern:$0x73625140]  ;;  %v57_v20 = vld.sshfl [vmem:[#allocation1 + $0x8] sm:$0xff pattern:$0x73625140]  ;;  %v1705_v40 = vor.u32 %v2332_v22, %v1702_v23  ;;  %v1769_v41 = vor.u32 %v2348_v24, %v1766_v32  ;;  %v45_v2 = vpack.c.bf16 %v44_v1, %v43_v0 }
   0xe   :  { %v65_v25 = vsel %vm64_vm1, %v56_v19, 0  ;;  %v67_v26 = vsel %vm64_vm1, %v57_v20, 0  ;;  %v58_v27 = vld.sshfl [vmem:[#allocation1 + $0x10] sm:$0xff pattern:$0x73625140]  ;;  %vm145_vm3 = vcmask 97280  }
   0xf   :  { %80 = vmatpush.bf16.msra.mxu0 %v65_v25  ;;  %94 = vmatpush.bf16.msra.mxu1 %v67_v26  ;;  %v69_v30 = vsel %vm64_vm1, %v58_v27, 0  ;;  %v59_v31 = vld.sshfl [vmem:[#allocation1 + $0x18] sm:$0xff pattern:$0x73625140]  ;;  %v1692_v38 = vld [vmem:[#allocation2 + $0x60] sm:$0xf] }
  0x10   :  { %108 = vmatpush.bf16.msra.mxu2 %v69_v30  ;;  %v71_v33 = vsel %vm64_vm1, %v59_v31, 0  ;;  %v2331_v39 = vld [vmem:[#allocation2 + $0x64] sm:$0xf0]  ;;  %v1756_v42 = vld [vmem:[#allocation2 + $0xe0] sm:$0xf]  ;;  %vm1610_vm4 = vcmask 15360  }
  0x11   :  { %122 = vmatpush.bf16.msra.mxu3 %v71_v33  ;;  %v2347_v43 = vld [vmem:[#allocation2 + $0xe4] sm:$0xf0]  ;;  %v2330_v44 = vld [vmem:[#allocation2 + $0x64] sm:$0xf]  ;;  %v1694_v45 = vld [vmem:[#allocation2 + $0x68] sm:$0xf0]  ;;  %v1693_v48 = vor.u32 %v2331_v39, %v1692_v38 }
  0x12   :  { %1618 = vmatmul.msk.bf16.vlgmr.msra.gmra.mxu0 %vm60_vm2, %v48_v28  ;;  %1619 = vmatmul.msk.bf16.vlgmr.msra.gmra.mxu1 %vm60_vm2, %v48_v28  ;;  %v2346_v46 = vld [vmem:[#allocation2 + $0xe4] sm:$0xf]  ;;  %v1758_v47 = vld [vmem:[#allocation2 + $0xe8] sm:$0xf0]  ;;  %v1757_v49 = vor.u32 %v2347_v43, %v1756_v42  ;;  %v1684_v50 = vld [vmem:[#allocation2 + $0x50] sm:$0xf]  ;;  %v1697_v52 = vor.u32 %v2330_v44, %v1694_v45 }
  0x13   :  { %169 = vmatpush.bf16.msrb.mxu0 %v151_v13  ;;  %183 = vmatpush.bf16.msrb.mxu1 %v154_v29  ;;  %v2329_v51 = vld [vmem:[#allocation2 + $0x54] sm:$0xf0]  ;;  %v1761_v53 = vor.u32 %v2346_v46, %v1758_v47  ;;  %v1748_v54 = vld [vmem:[#allocation2 + $0xd0] sm:$0xf]  ;;  %v2328_v56 = vld [vmem:[#allocation2 + $0x54] sm:$0xf] }
  0x14   :  { %1620 = vmatmul.msk.bf16.vlgmr.msra.gmra.mxu2 %vm60_vm2, %v48_v28  ;;  %1621 = vmatmul.msk.bf16.vlgmr.msra.gmra.mxu3 %vm60_vm2, %v48_v28  ;;  %v2345_v55 = vld [vmem:[#allocation2 + $0xd4] sm:$0xf0]  ;;  %v1686_v57 = vld [vmem:[#allocation2 + $0x58] sm:$0xf0]  ;;  %v2344_v58 = vld [vmem:[#allocation2 + $0xd4] sm:$0xf]  ;;  %v1685_v60 = vor.u32 %v2329_v51, %v1684_v50 }
  0x15   :  { %211 = vmatpush.bf16.msrb.mxu3 %v160_v34  ;;  %197 = vmatpush.bf16.msrb.mxu2 %v157_v35  ;;  %v1750_v59 = vld [vmem:[#allocation2 + $0xd8] sm:$0xf0]  ;;  %v1749_v61 = vor.u32 %v2345_v55, %v1748_v54  ;;  %v1689_v62 = vor.u32 %v2328_v56, %v1686_v57  ;;  %v1676_v3 = vld [vmem:[#allocation2 + $0x40] sm:$0xf]  ;;  %v2327_v4 = vld [vmem:[#allocation2 + $0x44] sm:$0xf0] }
  0x16   :  { %v1753_v63 = vor.u32 %v2344_v58, %v1750_v59  ;;  %v1740_v5 = vld [vmem:[#allocation2 + $0xc0] sm:$0xf]  ;;  %v1677_v6 = vor.u32 %v2327_v4, %v1676_v3  ;;  %v2343_v7 = vld [vmem:[#allocation2 + $0xc4] sm:$0xf0]  ;;  %v2326_v8 = vld [vmem:[#allocation2 + $0x44] sm:$0xf] }
  0x17   :  { %446 = vmatpush.bf16.msra.mxu0 %v1701_v36  ;;  %460 = vmatpush.bf16.msra.mxu1 %v1765_v37  ;;  %v1678_v9 = vld [vmem:[#allocation2 + $0x48] sm:$0xf0]  ;;  %v1741_v10 = vor.u32 %v2343_v7, %v1740_v5  ;;  %v2342_v12 = vld [vmem:[#allocation2 + $0xc4] sm:$0xf]  ;;  %v1668_v14 = vld [vmem:[#allocation2 + $0x30] sm:$0xf] }
  0x18   :  { %v1681_v11 = vor.u32 %v2326_v8, %v1678_v9  ;;  %v1742_v13 = vld [vmem:[#allocation2 + $0xc8] sm:$0xf0]  ;;  %v2325_v16 = vld [vmem:[#allocation2 + $0x34] sm:$0xf0]  ;;  %v1732_v17 = vld [vmem:[#allocation2 + $0xb0] sm:$0xf] }
  0x19   :  { %474 = vmatpush.bf16.msra.mxu2 %v1705_v40  ;;  %488 = vmatpush.bf16.msra.mxu3 %v1769_v41  ;;  %v1745_v15 = vor.u32 %v2342_v12, %v1742_v13  ;;  %v2341_v18 = vld [vmem:[#allocation2 + $0xb4] sm:$0xf0]  ;;  %v1669_v19 = vor.u32 %v2325_v16, %v1668_v14  ;;  %v2324_v21 = vld [vmem:[#allocation2 + $0x34] sm:$0xf]  ;;  %v1670_v22 = vld [vmem:[#allocation2 + $0x38] sm:$0xf0] }
  0x1a   :  { %v1733_v20 = vor.u32 %v2341_v18, %v1732_v17  ;;  %v2340_v23 = vld [vmem:[#allocation2 + $0xb4] sm:$0xf]  ;;  %v1673_v24 = vor.u32 %v2324_v21, %v1670_v22  ;;  %v1734_v25 = vld [vmem:[#allocation2 + $0xb8] sm:$0xf0]  ;;  %v1660_v27 = vld [vmem:[#allocation2 + $0x20] sm:$0xf] }
  0x1b   :  { %447 = vmatpush.bf16.msra.mxu0 %v1693_v48  ;;  %461 = vmatpush.bf16.msra.mxu1 %v1757_v49  ;;  %v1737_v26 = vor.u32 %v2340_v23, %v1734_v25  ;;  %v2323_v28 = vld [vmem:[#allocation2 + $0x24] sm:$0xf0]  ;;  %v1724_v29 = vld [vmem:[#allocation2 + $0xa0] sm:$0xf]  ;;  %v2322_v32 = vld [vmem:[#allocation2 + $0x24] sm:$0xf] }
  0x1c   :  { %v1661_v30 = vor.u32 %v2323_v28, %v1660_v27  ;;  %v2339_v31 = vld [vmem:[#allocation2 + $0xa4] sm:$0xf0]  ;;  %v1662_v33 = vld [vmem:[#allocation2 + $0x28] sm:$0xf0]  ;;  %v2338_v36 = vld [vmem:[#allocation2 + $0xa4] sm:$0xf] }
  0x1d   :  { %475 = vmatpush.bf16.msra.mxu2 %v1697_v52  ;;  %489 = vmatpush.bf16.msra.mxu3 %v1761_v53  ;;  %v1725_v34 = vor.u32 %v2339_v31, %v1724_v29  ;;  %v1665_v35 = vor.u32 %v2322_v32, %v1662_v33  ;;  %v1726_v37 = vld [vmem:[#allocation2 + $0xa8] sm:$0xf0]  ;;  %v1652_v38 = vld [vmem:[#allocation2 + $0x10] sm:$0xf]  ;;  %v2321_v40 = vld [vmem:[#allocation2 + $0x14] sm:$0xf0] }
  0x1e   :  { %v1729_v39 = vor.u32 %v2338_v36, %v1726_v37  ;;  %v1716_v41 = vld [vmem:[#allocation2 + $0x90] sm:$0xf]  ;;  %v2337_v42 = vld [vmem:[#allocation2 + $0x94] sm:$0xf0]  ;;  %v1653_v43 = vor.u32 %v2321_v40, %v1652_v38  ;;  %v2320_v45 = vld [vmem:[#allocation2 + $0x14] sm:$0xf] }
  0x1f   :  { %448 = vmatpush.bf16.msra.mxu0 %v1685_v60  ;;  %462 = vmatpush.bf16.msra.mxu1 %v1749_v61  ;;  %v1717_v44 = vor.u32 %v2337_v42, %v1716_v41  ;;  %v1654_v46 = vld [vmem:[#allocation2 + $0x18] sm:$0xf0]  ;;  %v2336_v47 = vld [vmem:[#allocation2 + $0x94] sm:$0xf]  ;;  %v1644_v51 = vld [vmem:[#allocation2] sm:$0xf] }
  0x20   :  { %v1657_v48 = vor.u32 %v2320_v45, %v1654_v46  ;;  %v1718_v49 = vld [vmem:[#allocation2 + $0x98] sm:$0xf0]  ;;  %v2319_v52 = vld [vmem:[#allocation2 + $0x4] sm:$0xf0]  ;;  %v1708_v53 = vld [vmem:[#allocation2 + $0x80] sm:$0xf] }
  0x21   :  { %476 = vmatpush.bf16.msra.mxu2 %v1689_v62  ;;  %490 = vmatpush.bf16.msra.mxu3 %v1753_v63  ;;  %v1721_v50 = vor.u32 %v2336_v47, %v1718_v49  ;;  %v1645_v54 = vor.u32 %v2319_v52, %v1644_v51  ;;  %v2335_v55 = vld [vmem:[#allocation2 + $0x84] sm:$0xf0]  ;;  %v2318_v56 = vld [vmem:[#allocation2 + $0x4] sm:$0xf]  ;;  %v1646_v58 = vld [vmem:[#allocation2 + $0x8] sm:$0xf0] }
  0x22   :  { %1638 = vmatmul.msk.bf16.vlgmr.msrb.gmra.mxu0 %vm145_vm3, %v45_v2  ;;  %1639 = vmatmul.msk.bf16.vlgmr.msrb.gmra.mxu1 %vm145_vm3, %v45_v2  ;;  %v1709_v57 = vor.u32 %v2335_v55, %v1708_v53  ;;  %v2334_v59 = vld [vmem:[#allocation2 + $0x84] sm:$0xf]  ;;  %v1649_v60 = vor.u32 %v2318_v56, %v1646_v58  ;;  %v1710_v61 = vld [vmem:[#allocation2 + $0x88] sm:$0xf0]  ;;  %v1828_v62 = vld [vmem:[#allocation2 + $0x170] sm:$0xf] }
  0x23   :  { %449 = vmatpush.bf16.msra.mxu0 %v1677_v6  ;;  %463 = vmatpush.bf16.msra.mxu1 %v1741_v10  ;;  %v1713_v63 = vor.u32 %v2334_v59, %v1710_v61  ;;  %v2365_v0 = vld [vmem:[#allocation2 + $0x174] sm:$0xf0]  ;;  %v1892_v1 = vld [vmem:[#allocation2 + $0x1f0] sm:$0xf]  ;;  %v2364_v5 = vld [vmem:[#allocation2 + $0x174] sm:$0xf] }
  0x24   :  { %1640 = vmatmul.msk.bf16.vlgmr.msrb.gmra.mxu2 %vm145_vm3, %v45_v2  ;;  %1641 = vmatmul.msk.bf16.vlgmr.msrb.gmra.mxu3 %vm145_vm3, %v45_v2  ;;  %v2381_v2 = vld [vmem:[#allocation2 + $0x1f4] sm:$0xf0]  ;;  %v1829_v3 = vor.u32 %v2365_v0, %v1828_v62  ;;  %v1830_v6 = vld [vmem:[#allocation2 + $0x178] sm:$0xf0]  ;;  %v2380_v7 = vld [vmem:[#allocation2 + $0x1f4] sm:$0xf] }
  0x25   :  { %477 = vmatpush.bf16.msra.mxu2 %v1681_v11  ;;  %491 = vmatpush.bf16.msra.mxu3 %v1745_v15  ;;  %v1893_v4 = vor.u32 %v2381_v2, %v1892_v1  ;;  %v1833_v8 = vor.u32 %v2364_v5, %v1830_v6  ;;  %v1894_v9 = vld [vmem:[#allocation2 + $0x1f8] sm:$0xf0]  ;;  %v1820_v10 = vld [vmem:[#allocation2 + $0x160] sm:$0xf]  ;;  %v2363_v11 = vld [vmem:[#allocation2 + $0x164] sm:$0xf0] }
  0x26   :  { %v1897_v12 = vor.u32 %v2380_v7, %v1894_v9  ;;  %v1821_v13 = vor.u32 %v2363_v11, %v1820_v10  ;;  %v1884_v14 = vld [vmem:[#allocation2 + $0x1e0] sm:$0xf]  ;;  %v2379_v15 = vld [vmem:[#allocation2 + $0x1e4] sm:$0xf0]  ;;  %v2362_v16 = vld [vmem:[#allocation2 + $0x164] sm:$0xf] }
  0x27   :  { %450 = vmatpush.bf16.msra.mxu0 %v1669_v19  ;;  %464 = vmatpush.bf16.msra.mxu1 %v1733_v20  ;;  %v1885_v17 = vor.u32 %v2379_v15, %v1884_v14  ;;  %v1822_v18 = vld [vmem:[#allocation2 + $0x168] sm:$0xf0]  ;;  %v2378_v19 = vld [vmem:[#allocation2 + $0x1e4] sm:$0xf]  ;;  %v1812_v22 = vld [vmem:[#allocation2 + $0x150] sm:$0xf] }
  0x28   :  { %v1825_v20 = vor.u32 %v2362_v16, %v1822_v18  ;;  %v1886_v21 = vld [vmem:[#allocation2 + $0x1e8] sm:$0xf0]  ;;  %v1876_v25 = vld [vmem:[#allocation2 + $0x1d0] sm:$0xf]  ;;  %v2360_v29 = vld [vmem:[#allocation2 + $0x154] sm:$0xf] }
  0x29   :  { %478 = vmatpush.bf16.msra.mxu2 %v1673_v24  ;;  %492 = vmatpush.bf16.msra.mxu3 %v1737_v26  ;;  %v1889_v23 = vor.u32 %v2378_v19, %v1886_v21  ;;  %v2361_v24 = vld [vmem:[#allocation2 + $0x154] sm:$0xf0]  ;;  %v2376_v31 = vld [vmem:[#allocation2 + $0x1d4] sm:$0xf]  ;;  %v1878_v33 = vld [vmem:[#allocation2 + $0x1d8] sm:$0xf0] }
  0x2a   :  { %v2377_v26 = vld [vmem:[#allocation2 + $0x1d4] sm:$0xf0]  ;;  %v1813_v27 = vor.u32 %v2361_v24, %v1812_v22  ;;  %v2359_v36 = vld [vmem:[#allocation2 + $0x144] sm:$0xf0]  ;;  %v1868_v37 = vld [vmem:[#allocation2 + $0x1c0] sm:$0xf] }
  0x2b   :  { %451 = vmatpush.bf16.msra.mxu0 %v1661_v30  ;;  %465 = vmatpush.bf16.msra.mxu1 %v1725_v34  ;;  %v1877_v28 = vor.u32 %v2377_v26, %v1876_v25  ;;  %v1814_v30 = vld [vmem:[#allocation2 + $0x158] sm:$0xf0]  ;;  %v1881_v34 = vor.u32 %v2376_v31, %v1878_v33  ;;  %v2375_v38 = vld [vmem:[#allocation2 + $0x1c4] sm:$0xf0]  ;;  %v1806_v40 = vld [vmem:[#allocation2 + $0x148] sm:$0xf0] }
  0x2c   :  { %v1817_v32 = vor.u32 %v2360_v29, %v1814_v30  ;;  %v1869_v42 = vor.u32 %v2375_v38, %v1868_v37  ;;  %v1796_v49 = vld [vmem:[#allocation2 + $0x130] sm:$0xf]  ;;  %v2373_v52 = vld [vmem:[#allocation2 + $0x1b4] sm:$0xf0]  ;;  %v2356_v53 = vld [vmem:[#allocation2 + $0x134] sm:$0xf] }
  0x2d   :  { %479 = vmatpush.bf16.msra.mxu2 %v1665_v35  ;;  %493 = vmatpush.bf16.msra.mxu3 %v1729_v39  ;;  %v1804_v35 = vld [vmem:[#allocation2 + $0x140] sm:$0xf]  ;;  %v2358_v39 = vld [vmem:[#allocation2 + $0x144] sm:$0xf]  ;;  %v1860_v51 = vld [vmem:[#allocation2 + $0x1b0] sm:$0xf] }
  0x2e   :  { %v1805_v41 = vor.u32 %v2359_v36, %v1804_v35  ;;  %v1809_v47 = vor.u32 %v2358_v39, %v1806_v40  ;;  %v1861_v56 = vor.u32 %v2373_v52, %v1860_v51  ;;  %v1862_v58 = vld [vmem:[#allocation2 + $0x1b8] sm:$0xf0]  ;;  %v1788_v61 = vld [vmem:[#allocation2 + $0x120] sm:$0xf]  ;;  %v2355_v62 = vld [vmem:[#allocation2 + $0x124] sm:$0xf0] }
  0x2f   :  { %452 = vmatpush.bf16.msra.mxu0 %v1653_v43  ;;  %466 = vmatpush.bf16.msra.mxu1 %v1717_v44  ;;  %v2374_v43 = vld [vmem:[#allocation2 + $0x1c4] sm:$0xf]  ;;  %v1870_v44 = vld [vmem:[#allocation2 + $0x1c8] sm:$0xf0]  ;;  %v2371_v0 = vld [vmem:[#allocation2 + $0x1a4] sm:$0xf0] }
  0x30   :  { %v2354_v1 = vld [vmem:[#allocation2 + $0x124] sm:$0xf]  ;;  %v1790_v2 = vld [vmem:[#allocation2 + $0x128] sm:$0xf0]  ;;  %v2369_v14 = vld [vmem:[#allocation2 + $0x194] sm:$0xf0] }
  0x31   :  { %480 = vmatpush.bf16.msra.mxu2 %v1657_v48  ;;  %494 = vmatpush.bf16.msra.mxu3 %v1721_v50  ;;  %v1873_v48 = vor.u32 %v2374_v43, %v1870_v44  ;;  %v2357_v50 = vld [vmem:[#allocation2 + $0x134] sm:$0xf0]  ;;  %v2370_v6 = vld [vmem:[#allocation2 + $0x1a4] sm:$0xf]  ;;  %v1854_v7 = vld [vmem:[#allocation2 + $0x1a8] sm:$0xf0]  ;;  %v1793_v11 = vor.u32 %v2354_v1, %v1790_v2 }
  0x32   :  { %v1797_v55 = vor.u32 %v2357_v50, %v1796_v49  ;;  %v1857_v16 = vor.u32 %v2370_v6, %v1854_v7  ;;  %v1782_v18 = vld [vmem:[#allocation2 + $0x118] sm:$0xf0]  ;;  %v2368_v19 = vld [vmem:[#allocation2 + $0x194] sm:$0xf]  ;;  %v2351_v25 = vld [vmem:[#allocation2 + $0x104] sm:$0xf0] }
  0x33   :  { %453 = vmatpush.bf16.msra.mxu0 %v1645_v54  ;;  %467 = vmatpush.bf16.msra.mxu1 %v1709_v57  ;;  %v1798_v54 = vld [vmem:[#allocation2 + $0x138] sm:$0xf0]  ;;  %v2372_v57 = vld [vmem:[#allocation2 + $0x1b4] sm:$0xf]  ;;  %v1836_v26 = vld [vmem:[#allocation2 + $0x180] sm:$0xf] }
  0x34   :  { %v1801_v59 = vor.u32 %v2356_v53, %v1798_v54  ;;  %v2350_v29 = vld [vmem:[#allocation2 + $0x104] sm:$0xf]  ;;  %v1774_v30 = vld [vmem:[#allocation2 + $0x108] sm:$0xf0]  ;;  %v2022_v1 = vld [vmem:[#allocation2 + $0x2f8] sm:$0xf0] }
  0x35   :  { %481 = vmatpush.bf16.msra.mxu2 %v1649_v60  ;;  %495 = vmatpush.bf16.msra.mxu3 %v1713_v63  ;;  %v1865_v60 = vor.u32 %v2372_v57, %v1862_v58  ;;  %v1852_v63 = vld [vmem:[#allocation2 + $0x1a0] sm:$0xf]  ;;  %v2366_v31 = vld [vmem:[#allocation2 + $0x184] sm:$0xf]  ;;  %v1777_v38 = vor.u32 %v2350_v29, %v1774_v30  ;;  %v1956_v57 = vld [vmem:[#allocation2 + $0x270] sm:$0xf] }
  0x36   :  { %v1853_v5 = vor.u32 %v2371_v0, %v1852_v63  ;;  %v2397_v58 = vld [vmem:[#allocation2 + $0x274] sm:$0xf0]  ;;  %v2412_v0 = vld [vmem:[#allocation2 + $0x2f4] sm:$0xf] }
  0x37   :  { %707 = vmatpush.bf16.msrb.mxu0 %v1829_v3  ;;  %721 = vmatpush.bf16.msrb.mxu1 %v1893_v4  ;;  %v1789_v4 = vor.u32 %v2355_v62, %v1788_v61  ;;  %v2020_v61 = vld [vmem:[#allocation2 + $0x2f0] sm:$0xf]  ;;  %v2413_v62 = vld [vmem:[#allocation2 + $0x2f4] sm:$0xf0]  ;;  %v1957_v6 = vor.u32 %v2397_v58, %v1956_v57  ;;  %v2392_v30 = vld [vmem:[#allocation2 + $0x254] sm:$0xf] }
  0x39   :  { %735 = vmatpush.bf16.msrb.mxu2 %v1833_v8  ;;  %749 = vmatpush.bf16.msrb.mxu3 %v1897_v12  ;;  %v1780_v8 = vld [vmem:[#allocation2 + $0x110] sm:$0xf]  ;;  %v2353_v12 = vld [vmem:[#allocation2 + $0x114] sm:$0xf0] }
  0x3a   :  { %v1781_v21 = vor.u32 %v2353_v12, %v1780_v8  ;;  %v1948_v8 = vld [vmem:[#allocation2 + $0x260] sm:$0xf] }
  0x3b   :  { %708 = vmatpush.bf16.msrb.mxu0 %v1821_v13  ;;  %722 = vmatpush.bf16.msrb.mxu1 %v1885_v17  ;;  %v1844_v13 = vld [vmem:[#allocation2 + $0x190] sm:$0xf]  ;;  %v2352_v17 = vld [vmem:[#allocation2 + $0x114] sm:$0xf] }
  0x3c   :  { %v1845_v22 = vor.u32 %v2369_v14, %v1844_v13  ;;  %v1785_v24 = vor.u32 %v2352_v17, %v1782_v18  ;;  %v2394_v13 = vld [vmem:[#allocation2 + $0x264] sm:$0xf]  ;;  %v1950_v14 = vld [vmem:[#allocation2 + $0x268] sm:$0xf0]  ;;  %v2012_v17 = vld [vmem:[#allocation2 + $0x2e0] sm:$0xf] }
  0x3d   :  { %736 = vmatpush.bf16.msrb.mxu2 %v1825_v20  ;;  %750 = vmatpush.bf16.msrb.mxu3 %v1889_v23  ;;  %v1846_v20 = vld [vmem:[#allocation2 + $0x198] sm:$0xf0]  ;;  %v1772_v23 = vld [vmem:[#allocation2 + $0x100] sm:$0xf] }
  0x3f   :  { %709 = vmatpush.bf16.msrb.mxu0 %v1813_v27  ;;  %723 = vmatpush.bf16.msrb.mxu1 %v1877_v28  ;;  %v2367_v27 = vld [vmem:[#allocation2 + $0x184] sm:$0xf0]  ;;  %v1849_v28 = vor.u32 %v2368_v19, %v1846_v20  ;;  %v2410_v20 = vld [vmem:[#allocation2 + $0x2e4] sm:$0xf] }
  0x40   :  { %v1837_v35 = vor.u32 %v2367_v27, %v1836_v26  ;;  %v2411_v19 = vld [vmem:[#allocation2 + $0x2e4] sm:$0xf0]  ;;  %v1953_v26 = vor.u32 %v2394_v13, %v1950_v14  ;;  %v1940_v27 = vld [vmem:[#allocation2 + $0x250] sm:$0xf]  ;;  %v2386_v14 = vld [vmem:[#allocation2 + $0x224] sm:$0xf] }
  0x41   :  { %737 = vmatpush.bf16.msrb.mxu2 %v1817_v32  ;;  %751 = vmatpush.bf16.msrb.mxu3 %v1881_v34  ;;  %v1838_v32 = vld [vmem:[#allocation2 + $0x188] sm:$0xf0]  ;;  %v1773_v34 = vor.u32 %v2351_v25, %v1772_v23 }
  0x42   :  { %v1841_v40 = vor.u32 %v2366_v31, %v1838_v32  ;;  %v1942_v31 = vld [vmem:[#allocation2 + $0x258] sm:$0xf0]  ;;  %v2013_v32 = vor.u32 %v2411_v19, %v2012_v17  ;;  %v2403_v19 = vld [vmem:[#allocation2 + $0x2a4] sm:$0xf0] }
  0x43   :  { %710 = vmatpush.bf16.msrb.mxu0 %v1805_v41  ;;  %724 = vmatpush.bf16.msrb.mxu1 %v1869_v42  ;;  %v2620_v41 = vld [vmem:[%s2755_s6] sm:$0xf] }
  0x44   :  { %v220_v43 = vperm.slane %v2620_v41, 0 }
  0x45   :  { %738 = vmatpush.bf16.msrb.mxu2 %v1809_v47  ;;  %752 = vmatpush.bf16.msrb.mxu3 %v1873_v48  ;;  %v221_v47 = vperm.slane %v2620_v41, 1 }
  0x47   :  { %711 = vmatpush.bf16.msrb.mxu0 %v1797_v55  ;;  %725 = vmatpush.bf16.msrb.mxu1 %v1861_v56 }
  0x49   :  { %739 = vmatpush.bf16.msrb.mxu2 %v1801_v59  ;;  %753 = vmatpush.bf16.msrb.mxu3 %v1865_v60  ;;  %v2396_v59 = vld [vmem:[#allocation2 + $0x274] sm:$0xf]  ;;  %v1958_v60 = vld [vmem:[#allocation2 + $0x278] sm:$0xf0] }
  0x4a   :  { %v1961_v7 = vor.u32 %v2396_v59, %v1958_v60  ;;  %v2388_v60 = vld [vmem:[#allocation2 + $0x234] sm:$0xf] }
  0x4b   :  { %712 = vmatpush.bf16.msrb.mxu0 %v1789_v4  ;;  %726 = vmatpush.bf16.msrb.mxu1 %v1853_v5 }
  0x4d   :  { %740 = vmatpush.bf16.msrb.mxu2 %v1793_v11  ;;  %754 = vmatpush.bf16.msrb.mxu3 %v1857_v16  ;;  %v2025_v16 = vor.u32 %v2412_v0, %v2022_v1  ;;  %v1988_v1 = vld [vmem:[#allocation2 + $0x2b0] sm:$0xf] }
  0x4f   :  { %713 = vmatpush.bf16.msrb.mxu0 %v1781_v21  ;;  %727 = vmatpush.bf16.msrb.mxu1 %v1845_v22  ;;  %v2014_v21 = vld [vmem:[#allocation2 + $0x2e8] sm:$0xf0] }
  0x51   :  { %741 = vmatpush.bf16.msrb.mxu2 %v1785_v24  ;;  %755 = vmatpush.bf16.msrb.mxu3 %v1849_v28  ;;  %v222_v24 = vperm.slane %v2620_v41, 2  ;;  %v2393_v28 = vld [vmem:[#allocation2 + $0x254] sm:$0xf0] }
  0x53   :  { %714 = vmatpush.bf16.msrb.mxu0 %v1773_v34  ;;  %728 = vmatpush.bf16.msrb.mxu1 %v1837_v35  ;;  %v2017_v34 = vor.u32 %v2410_v20, %v2014_v21  ;;  %v2004_v35 = vld [vmem:[#allocation2 + $0x2d0] sm:$0xf]  ;;  %v2402_v20 = vld [vmem:[#allocation2 + $0x2a4] sm:$0xf]  ;;  %v1982_v21 = vld [vmem:[#allocation2 + $0x2a8] sm:$0xf0] }
  0x55   :  { %742 = vmatpush.bf16.msrb.mxu2 %v1777_v38  ;;  %756 = vmatpush.bf16.msrb.mxu3 %v1841_v40  ;;  %v2006_v38 = vld [vmem:[#allocation2 + $0x2d8] sm:$0xf0]  ;;  %v1941_v40 = vor.u32 %v2393_v28, %v1940_v27 }
  0x56   :  { %v1910_v27 = vld [vmem:[#allocation2 + $0x218] sm:$0xf0] }
  0x8f   :  { %v2605_v45 = vpop.f32.mrf.mxu0  ;;  %v2607_v46 = vpop.f32.mrf.mxu1 }
  0x97   :  { %v2609_v3 = vpop.f32.mrf.mxu2  ;;  %v2611_v9 = vpop.f32.mrf.mxu3 }
  0x98   :  { %v84_v10 = vpop.f32.mrf.mxu0  ;;  %v98_v15 = vpop.f32.mrf.mxu1 }
  0x9f   :  { %v2613_v33 = vpop.f32.mrf.mxu2  ;;  %v2615_v36 = vpop.f32.mrf.mxu3 }
  0xa0   :  { %v171_v37 = vpop.f32.mrf.mxu0  ;;  %v185_v39 = vpop.f32.mrf.mxu1 }
  0xa1   :  { %v172_v42 = vadd.f32 %v171_v37, %v2605_v45  ;;  %v186_v44 = vadd.f32 %v185_v39, %v2607_v46  ;;  %v2409_v37 = vld [vmem:[#allocation2 + $0x2d4] sm:$0xf0] }
  0xa3   :  { %v228_v51 = vadd.f32 %v220_v43, %v172_v42  ;;  %v229_v54 = vadd.f32 %v221_v47, %v186_v44  ;;  %v1932_v44 = vld [vmem:[#allocation2 + $0x240] sm:$0xf] }
  0xa5   :  { %v236_v63 = vmax.f32 %v228_v51, 0.0  ;;  %v237_v2 = vmax.f32 %v229_v54, 0.0  ;;  %v1934_v51 = vld [vmem:[#allocation2 + $0x248] sm:$0xf0]  ;;  %v1996_v54 = vld [vmem:[#allocation2 + $0x2c0] sm:$0xf] }
  0xa7   :  { %v199_v48 = vpop.f32.mrf.mxu2  ;;  %v213_v49 = vpop.f32.mrf.mxu3 }
  0xa8   :  { %v173_v50 = vpop.f32.mrf.mxu0  ;;  %v187_v53 = vpop.f32.mrf.mxu1  ;;  %v200_v23 = vadd.f32 %v199_v48, %v2609_v3  ;;  %v2408_v3 = vld [vmem:[#allocation2 + $0x2d4] sm:$0xf]  ;;  %v214_v39 = vadd.f32 %v213_v49, %v2611_v9  ;;  %v2406_v9 = vld [vmem:[#allocation2 + $0x2c4] sm:$0xf]  ;;  %v1998_v49 = vld [vmem:[#allocation2 + $0x2c8] sm:$0xf0] }
  0xa9   :  { %v174_v52 = vadd.f32 %v173_v50, %v84_v10  ;;  %v188_v55 = vadd.f32 %v187_v53, %v98_v15  ;;  %v2395_v10 = vld [vmem:[#allocation2 + $0x264] sm:$0xf0]  ;;  %v2021_v15 = vor.u32 %v2413_v62, %v2020_v61  ;;  %v2390_v50 = vld [vmem:[#allocation2 + $0x244] sm:$0xf]  ;;  %v2009_v53 = vor.u32 %v2408_v3, %v2006_v38  ;;  %v1902_v3 = vld [vmem:[#allocation2 + $0x208] sm:$0xf0] }
  0xaa   :  { %v1949_v22 = vor.u32 %v2395_v10, %v1948_v8  ;;  %v230_v42 = vadd.f32 %v222_v24, %v200_v23  ;;  %v1937_v59 = vor.u32 %v2390_v50, %v1934_v51  ;;  %v2001_v0 = vor.u32 %v2406_v9, %v1998_v49  ;;  %v2084_v38 = vld [vmem:[#allocation2 + $0x370] sm:$0xf]  ;;  %v1974_v50 = vld [vmem:[#allocation2 + $0x298] sm:$0xf0]  ;;  %v2426_v9 = vld [vmem:[#allocation2 + $0x364] sm:$0xf] }
  0xab   :  { %v232_v56 = vadd.f32 %v220_v43, %v174_v52  ;;  %v233_v45 = vadd.f32 %v221_v47, %v188_v55  ;;  %v2391_v47 = vld [vmem:[#allocation2 + $0x244] sm:$0xf0]  ;;  %v2005_v52 = vor.u32 %v2409_v37, %v2004_v35  ;;  %v2382_v35 = vld [vmem:[#allocation2 + $0x204] sm:$0xf]  ;;  %v2078_v49 = vld [vmem:[#allocation2 + $0x368] sm:$0xf0] }
  0xac   :  { %v2407_v55 = vld [vmem:[#allocation2 + $0x2c4] sm:$0xf0]  ;;  %v1933_v58 = vor.u32 %v2391_v47, %v1932_v44  ;;  %v238_v61 = vmax.f32 %v230_v42, 0.0  ;;  %v2428_v42 = vld [vmem:[#allocation2 + $0x374] sm:$0xf] }
  0xad   :  { %v240_v46 = vmax.f32 %v232_v56, 0.0  ;;  %v241_v4 = vmax.f32 %v233_v45, 0.0  ;;  %v1924_v56 = vld [vmem:[#allocation2 + $0x230] sm:$0xf]  ;;  %v2389_v45 = vld [vmem:[#allocation2 + $0x234] sm:$0xf0] }
  0xae   :  { %v1925_v8 = vor.u32 %v2389_v45, %v1924_v56  ;;  %v2401_v47 = vld [vmem:[#allocation2 + $0x294] sm:$0xf0]  ;;  %v2081_v56 = vor.u32 %v2426_v9, %v2078_v49  ;;  %v2416_v49 = vld [vmem:[#allocation2 + $0x314] sm:$0xf] }
  0xaf   :  { %v244_v5 = vpack.c.bf16 %v240_v46, %v236_v63  ;;  %v245_v11 = vpack.c.bf16 %v241_v4, %v237_v2  ;;  %v201_v12 = vpop.f32.mrf.mxu2  ;;  %v215_v18 = vpop.f32.mrf.mxu3  ;;  %v1926_v63 = vld [vmem:[#allocation2 + $0x238] sm:$0xf0]  ;;  %v1997_v46 = vor.u32 %v2407_v55, %v1996_v54  ;;  %v2405_v2 = vld [vmem:[#allocation2 + $0x2b4] sm:$0xf0]  ;;  %v2404_v4 = vld [vmem:[#allocation2 + $0x2b4] sm:$0xf] }
  0xb0   :  { %v202_v25 = vadd.f32 %v201_v12, %v2613_v33  ;;  %v216_v29 = vadd.f32 %v215_v18, %v2615_v36  ;;  %v223_v33 = vperm.slane %v2620_v41, 3  ;;  %v1945_v36 = vor.u32 %v2392_v30, %v1942_v31  ;;  %v2387_v12 = vld [vmem:[#allocation2 + $0x224] sm:$0xf0]  ;;  %v1980_v18 = vld [vmem:[#allocation2 + $0x2a0] sm:$0xf] }
  0xb1   :  { %454 = vmatmul.bf16.vlgmr.msra.gmra.mxu0 %v244_v5  ;;  %482 = vmatmul.bf16.vlgmr.msra.gmra.mxu2 %v244_v5  ;;  %v1990_v5 = vld [vmem:[#allocation2 + $0x2b8] sm:$0xf0]  ;;  %v1929_v10 = vor.u32 %v2388_v60, %v1926_v63  ;;  %v1981_v28 = vor.u32 %v2403_v19, %v1980_v18  ;;  %v2427_v54 = vld [vmem:[#allocation2 + $0x364] sm:$0xf0]  ;;  %v2444_v63 = vld [vmem:[#allocation2 + $0x3f4] sm:$0xf] }
  0xb2   :  { %468 = vmatmul.bf16.vlgmr.msra.gmra.mxu1 %v245_v11  ;;  %496 = vmatmul.bf16.vlgmr.msra.gmra.mxu3 %v245_v11  ;;  %v234_v43 = vadd.f32 %v222_v24, %v202_v25  ;;  %v235_v48 = vadd.f32 %v223_v33, %v216_v29  ;;  %v231_v41 = vadd.f32 %v223_v33, %v214_v39  ;;  %v1916_v11 = vld [vmem:[#allocation2 + $0x220] sm:$0xf]  ;;  %v1908_v24 = vld [vmem:[#allocation2 + $0x210] sm:$0xf]  ;;  %v2385_v25 = vld [vmem:[#allocation2 + $0x214] sm:$0xf0] }
  0xb3   :  { %968 = vmatpush.bf16.msra.mxu0 %v1957_v6  ;;  %996 = vmatpush.bf16.msra.mxu2 %v1961_v7  ;;  %v1993_v17 = vor.u32 %v2404_v4, %v1990_v5  ;;  %v1985_v29 = vor.u32 %v2402_v20, %v1982_v21  ;;  %v1909_v30 = vor.u32 %v2385_v25, %v1908_v24  ;;  %v2429_v39 = vld [vmem:[#allocation2 + $0x374] sm:$0xf0]  ;;  %v2422_v18 = vld [vmem:[#allocation2 + $0x344] sm:$0xf]  ;;  %v2062_v20 = vld [vmem:[#allocation2 + $0x348] sm:$0xf0] }
  0xb4   :  { %982 = vmatpush.bf16.msra.mxu1 %v2021_v15  ;;  %1010 = vmatpush.bf16.msra.mxu3 %v2025_v16  ;;  %v242_v57 = vmax.f32 %v234_v43, 0.0  ;;  %v243_v62 = vmax.f32 %v235_v48, 0.0  ;;  %v239_v6 = vmax.f32 %v231_v41, 0.0  ;;  %v1918_v15 = vld [vmem:[#allocation2 + $0x228] sm:$0xf0]  ;;  %v1989_v16 = vor.u32 %v2405_v2, %v1988_v1 }
  0xb5   :  { %v1921_v23 = vor.u32 %v2386_v14, %v1918_v15  ;;  %v1905_v33 = vor.u32 %v2382_v35, %v1902_v3  ;;  %v2086_v43 = vld [vmem:[#allocation2 + $0x378] sm:$0xf0]  ;;  %v2400_v48 = vld [vmem:[#allocation2 + $0x294] sm:$0xf]  ;;  %v1964_v41 = vld [vmem:[#allocation2 + $0x280] sm:$0xf]  ;;  %v2065_v21 = vor.u32 %v2422_v18, %v2062_v20 }
  0xb6   :  { %v246_v7 = vpack.c.bf16 %v242_v57, %v238_v61  ;;  %v247_v13 = vpack.c.bf16 %v243_v62, %v239_v6  ;;  %v2089_v44 = vor.u32 %v2428_v42, %v2086_v43  ;;  %v2399_v57 = vld [vmem:[#allocation2 + $0x284] sm:$0xf0]  ;;  %v2148_v61 = vld [vmem:[#allocation2 + $0x3f0] sm:$0xf]  ;;  %v2445_v62 = vld [vmem:[#allocation2 + $0x3f4] sm:$0xf0] }
  0xb7   :  { %969 = vmatpush.bf16.msra.mxu0 %v1949_v22  ;;  %997 = vmatpush.bf16.msra.mxu2 %v1953_v26  ;;  %v1917_v22 = vor.u32 %v2387_v12, %v1916_v11  ;;  %v2384_v26 = vld [vmem:[#allocation2 + $0x214] sm:$0xf]  ;;  %v1965_v45 = vor.u32 %v2399_v57, %v1964_v41  ;;  %v2068_v1 = vld [vmem:[#allocation2 + $0x350] sm:$0xf]  ;;  %v2425_v2 = vld [vmem:[#allocation2 + $0x354] sm:$0xf0] }
  0xb8   :  { %983 = vmatpush.bf16.msra.mxu1 %v2013_v32  ;;  %1011 = vmatpush.bf16.msra.mxu3 %v2017_v34  ;;  %v1913_v31 = vor.u32 %v2384_v26, %v1910_v27  ;;  %v1900_v32 = vld [vmem:[#allocation2 + $0x200] sm:$0xf]  ;;  %v2383_v34 = vld [vmem:[#allocation2 + $0x204] sm:$0xf0]  ;;  %v2069_v5 = vor.u32 %v2425_v2, %v2068_v1  ;;  %v2424_v6 = vld [vmem:[#allocation2 + $0x354] sm:$0xf] }
  0xb9   :  { %v1901_v37 = vor.u32 %v2383_v34, %v1900_v32  ;;  %v2443_v11 = vld [vmem:[#allocation2 + $0x3e4] sm:$0xf0]  ;;  %v2442_v12 = vld [vmem:[#allocation2 + $0x3e4] sm:$0xf]  ;;  %v2142_v14 = vld [vmem:[#allocation2 + $0x3e8] sm:$0xf0] }
  0xba   :  { %v2145_v15 = vor.u32 %v2442_v12, %v2142_v14  ;;  %v2440_v24 = vld [vmem:[#allocation2 + $0x3d4] sm:$0xf]  ;;  %v2134_v26 = vld [vmem:[#allocation2 + $0x3d8] sm:$0xf0]  ;;  %v2124_v35 = vld [vmem:[#allocation2 + $0x3c0] sm:$0xf] }
  0xbb   :  { %970 = vmatpush.bf16.msra.mxu0 %v1941_v40  ;;  %998 = vmatpush.bf16.msra.mxu2 %v1945_v36  ;;  %v2085_v40 = vor.u32 %v2429_v39, %v2084_v38  ;;  %v1972_v36 = vld [vmem:[#allocation2 + $0x290] sm:$0xf]  ;;  %v2137_v27 = vor.u32 %v2440_v24, %v2134_v26  ;;  %v2054_v32 = vld [vmem:[#allocation2 + $0x338] sm:$0xf0]  ;;  %v2438_v3 = vld [vmem:[#allocation2 + $0x3c4] sm:$0xf] }
  0xbc   :  { %984 = vmatpush.bf16.msra.mxu1 %v2005_v52  ;;  %1012 = vmatpush.bf16.msra.mxu3 %v2009_v53  ;;  %v1973_v51 = vor.u32 %v2401_v47, %v1972_v36  ;;  %v1977_v52 = vor.u32 %v2400_v48, %v1974_v50  ;;  %v2076_v53 = vld [vmem:[#allocation2 + $0x360] sm:$0xf]  ;;  %v2126_v39 = vld [vmem:[#allocation2 + $0x3c8] sm:$0xf0]  ;;  %v2419_v42 = vld [vmem:[#allocation2 + $0x324] sm:$0xf0] }
  0xbd   :  { %v2077_v55 = vor.u32 %v2427_v54, %v2076_v53  ;;  %v2418_v36 = vld [vmem:[#allocation2 + $0x324] sm:$0xf]  ;;  %v2116_v48 = vld [vmem:[#allocation2 + $0x3b0] sm:$0xf]  ;;  %v2437_v50 = vld [vmem:[#allocation2 + $0x3b4] sm:$0xf0] }
  0xbe   :  { %v2118_v53 = vld [vmem:[#allocation2 + $0x3b8] sm:$0xf0]  ;;  %v2417_v9 = vld [vmem:[#allocation2 + $0x314] sm:$0xf0]  ;;  %v2430_v18 = vld [vmem:[#allocation2 + $0x384] sm:$0xf] }
  0xbf   :  { %971 = vmatpush.bf16.msra.mxu0 %v1933_v58  ;;  %999 = vmatpush.bf16.msra.mxu2 %v1937_v59  ;;  %v2398_v58 = vld [vmem:[#allocation2 + $0x284] sm:$0xf]  ;;  %v1966_v59 = vld [vmem:[#allocation2 + $0x288] sm:$0xf0]  ;;  %v280_v1 = vld [vmem:[%s2755_s6 + $0x4] sm:$0x3] }
  0xc0   :  { %985 = vmatpush.bf16.msra.mxu1 %v1997_v46  ;;  %1013 = vmatpush.bf16.msra.mxu3 %v2001_v0  ;;  %v1969_v60 = vor.u32 %v2398_v58, %v1966_v59  ;;  %v2149_v46 = vor.u32 %v2445_v62, %v2148_v61  ;;  %v2150_v0 = vld [vmem:[#allocation2 + $0x3f8] sm:$0xf0]  ;;  %v2108_v58 = vld [vmem:[#allocation2 + $0x3a0] sm:$0xf]  ;;  %v2435_v59 = vld [vmem:[#allocation2 + $0x3a4] sm:$0xf0] }
  0xc1   :  { %715 = vmatmul.bf16.vlgmr.msrb.gmra.mxu0 %v246_v7  ;;  %743 = vmatmul.bf16.vlgmr.msrb.gmra.mxu2 %v246_v7  ;;  %v2153_v4 = vor.u32 %v2444_v63, %v2150_v0  ;;  %v2070_v7 = vld [vmem:[#allocation2 + $0x358] sm:$0xf0]  ;;  %v2110_v61 = vld [vmem:[#allocation2 + $0x3a8] sm:$0xf0]  ;;  %v2028_v63 = vld [vmem:[#allocation2 + $0x300] sm:$0xf] }
  0xc2   :  { %729 = vmatmul.bf16.vlgmr.msrb.gmra.mxu1 %v247_v13  ;;  %757 = vmatmul.bf16.vlgmr.msrb.gmra.mxu3 %v247_v13  ;;  %v2414_v0 = vld [vmem:[#allocation2 + $0x304] sm:$0xf]  ;;  %v2102_v12 = vld [vmem:[#allocation2 + $0x398] sm:$0xf0]  ;;  %v2094_v20 = vld [vmem:[#allocation2 + $0x388] sm:$0xf0] }
  0xc3   :  { %972 = vmatpush.bf16.msra.mxu0 %v1925_v8  ;;  %1000 = vmatpush.bf16.msra.mxu2 %v1929_v10  ;;  %v2073_v8 = vor.u32 %v2424_v6, %v2070_v7  ;;  %v2140_v10 = vld [vmem:[#allocation2 + $0x3e0] sm:$0xf]  ;;  %v2100_v6 = vld [vmem:[#allocation2 + $0x390] sm:$0xf]  ;;  %v2433_v7 = vld [vmem:[#allocation2 + $0x394] sm:$0xf0] }
  0xc4   :  { %986 = vmatpush.bf16.msra.mxu1 %v1989_v16  ;;  %1014 = vmatpush.bf16.msra.mxu3 %v1993_v17  ;;  %v2141_v13 = vor.u32 %v2443_v11, %v2140_v10  ;;  %v2060_v16 = vld [vmem:[#allocation2 + $0x340] sm:$0xf]  ;;  %v2423_v17 = vld [vmem:[#allocation2 + $0x344] sm:$0xf0]  ;;  %v2101_v11 = vor.u32 %v2433_v7, %v2100_v6  ;;  %v283_v24 = vperm.slane %v280_v1, 1 }
  0xc5   :  { %v2061_v19 = vor.u32 %v2423_v17, %v2060_v16  ;;  %v2092_v16 = vld [vmem:[#allocation2 + $0x380] sm:$0xf]  ;;  %v2431_v17 = vld [vmem:[#allocation2 + $0x384] sm:$0xf0] }
  0xc6   :  { %v2460_v7 = vld [vmem:[%s2754_s5 + $0x70] sm:$0xff] }
  0xc7   :  { %973 = vmatpush.bf16.msra.mxu0 %v1917_v22  ;;  %1001 = vmatpush.bf16.msra.mxu2 %v1921_v23  ;;  %v2132_v22 = vld [vmem:[#allocation2 + $0x3d0] sm:$0xf]  ;;  %v2441_v23 = vld [vmem:[#allocation2 + $0x3d4] sm:$0xf0] }
  0xc8   :  { %987 = vmatpush.bf16.msra.mxu1 %v1981_v28  ;;  %1015 = vmatpush.bf16.msra.mxu3 %v1985_v29  ;;  %v2133_v25 = vor.u32 %v2441_v23, %v2132_v22  ;;  %v2052_v28 = vld [vmem:[#allocation2 + $0x330] sm:$0xf]  ;;  %v2421_v29 = vld [vmem:[#allocation2 + $0x334] sm:$0xf0]  ;;  %v2097_v22 = vor.u32 %v2430_v18, %v2094_v20  ;;  %v2467_v18 = vld [vmem:[%s2754_s5 + $0xa8] sm:$0xff] }
  0xc9   :  { %v2476_v20 = vld [vmem:[%s2754_s5 + $0xf0] sm:$0xff] }
  0xcb   :  { %974 = vmatpush.bf16.msra.mxu0 %v1909_v30  ;;  %1002 = vmatpush.bf16.msra.mxu2 %v1913_v31  ;;  %v2053_v30 = vor.u32 %v2421_v29, %v2052_v28  ;;  %v2420_v31 = vld [vmem:[#allocation2 + $0x334] sm:$0xf] }
  0xcc   :  { %988 = vmatpush.bf16.msra.mxu1 %v1973_v51  ;;  %1016 = vmatpush.bf16.msra.mxu3 %v1977_v52  ;;  %v2057_v34 = vor.u32 %v2420_v31, %v2054_v32  ;;  %v2436_v51 = vld [vmem:[#allocation2 + $0x3b4] sm:$0xf]  ;;  %v2117_v52 = vor.u32 %v2437_v50, %v2116_v48 }
  0xcd   :  { %v2121_v54 = vor.u32 %v2436_v51, %v2118_v53  ;;  %v2461_v51 = vld [vmem:[%s2754_s5 + $0x78] sm:$0xff] }
  0xcf   :  { %975 = vmatpush.bf16.msra.mxu0 %v1901_v37  ;;  %1003 = vmatpush.bf16.msra.mxu2 %v1905_v33  ;;  %v2439_v37 = vld [vmem:[#allocation2 + $0x3c4] sm:$0xf0]  ;;  %v2129_v33 = vor.u32 %v2438_v3, %v2126_v39  ;;  %v2453_v3 = vld [vmem:[%s2754_s5 + $0x38] sm:$0xff] }
  0xd0   :  { %989 = vmatpush.bf16.msra.mxu1 %v1965_v45  ;;  %1017 = vmatpush.bf16.msra.mxu3 %v1969_v60  ;;  %v2125_v38 = vor.u32 %v2439_v37, %v2124_v35  ;;  %v2434_v45 = vld [vmem:[#allocation2 + $0x3a4] sm:$0xf]  ;;  %v2109_v60 = vor.u32 %v2435_v59, %v2108_v58  ;;  %v541_v37 = vld [vmem:[%s2755_s6 + $0x6] sm:$0x3] }
  0xd1   :  { %v2113_v62 = vor.u32 %v2434_v45, %v2110_v61 }
  0xd3   :  { %1229 = vmatpush.bf16.msrb.mxu0 %v2085_v40  ;;  %1257 = vmatpush.bf16.msrb.mxu2 %v2089_v44  ;;  %v2044_v40 = vld [vmem:[#allocation2 + $0x320] sm:$0xf]  ;;  %v2046_v44 = vld [vmem:[#allocation2 + $0x328] sm:$0xf0] }
  0xd4   :  { %1243 = vmatpush.bf16.msrb.mxu1 %v2149_v46  ;;  %1271 = vmatpush.bf16.msrb.mxu3 %v2153_v4  ;;  %v2045_v43 = vor.u32 %v2419_v42, %v2044_v40  ;;  %v2049_v47 = vor.u32 %v2418_v36, %v2046_v44  ;;  %v2415_v46 = vld [vmem:[#allocation2 + $0x304] sm:$0xf0]  ;;  %v2030_v4 = vld [vmem:[#allocation2 + $0x308] sm:$0xf0]  ;;  %v543_v36 = vperm.slane %v541_v37, 0 }
  0xd5   :  { %v2029_v2 = vor.u32 %v2415_v46, %v2028_v63 }
  0xd7   :  { %1230 = vmatpush.bf16.msrb.mxu0 %v2077_v55  ;;  %1258 = vmatpush.bf16.msrb.mxu2 %v2081_v56  ;;  %v2036_v55 = vld [vmem:[#allocation2 + $0x310] sm:$0xf]  ;;  %v2038_v56 = vld [vmem:[#allocation2 + $0x318] sm:$0xf0] }
  0xd8   :  { %1244 = vmatpush.bf16.msrb.mxu1 %v2141_v13  ;;  %1272 = vmatpush.bf16.msrb.mxu3 %v2145_v15  ;;  %v2037_v41 = vor.u32 %v2417_v9, %v2036_v55  ;;  %v2041_v57 = vor.u32 %v2416_v49, %v2038_v56  ;;  %v282_v13 = vperm.slane %v280_v1, 0  ;;  %v2451_v55 = vld [vmem:[%s2754_s5 + $0x28] sm:$0xff]  ;;  %v544_v9 = vperm.slane %v541_v37, 1 }
  0xd9   :  { %v802_v37 = vld [vmem:[%s2755_s6 + $0x8] sm:$0x3] }
  0xdb   :  { %1231 = vmatpush.bf16.msrb.mxu0 %v2069_v5  ;;  %1259 = vmatpush.bf16.msrb.mxu2 %v2073_v8  ;;  %v2033_v5 = vor.u32 %v2414_v0, %v2030_v4  ;;  %v2432_v8 = vld [vmem:[#allocation2 + $0x394] sm:$0xf] }
  0xdc   :  { %1245 = vmatpush.bf16.msrb.mxu1 %v2133_v25  ;;  %1273 = vmatpush.bf16.msrb.mxu3 %v2137_v27  ;;  %v2105_v15 = vor.u32 %v2432_v8, %v2102_v12  ;;  %v2450_v8 = vld [vmem:[%s2754_s5 + $0x20] sm:$0xff]  ;;  %v2449_v12 = vld [vmem:[%s2754_s5 + $0x18] sm:$0xff] }
  0xdf   :  { %1232 = vmatpush.bf16.msrb.mxu0 %v2061_v19  ;;  %1260 = vmatpush.bf16.msrb.mxu2 %v2065_v21  ;;  %v2093_v19 = vor.u32 %v2431_v17, %v2092_v16  ;;  %v2477_v16 = vld [vmem:[%s2754_s5 + $0xf8] sm:$0xff] }
  0xe0   :  { %1246 = vmatpush.bf16.msrb.mxu1 %v2125_v38  ;;  %1274 = vmatpush.bf16.msrb.mxu3 %v2129_v33  ;;  %v2457_v17 = vld [vmem:[%s2754_s5 + $0x58] sm:$0xff] }
  0xe3   :  { %1233 = vmatpush.bf16.msrb.mxu0 %v2053_v30  ;;  %1261 = vmatpush.bf16.msrb.mxu2 %v2057_v34 }
  0xe4   :  { %1247 = vmatpush.bf16.msrb.mxu1 %v2117_v52  ;;  %1275 = vmatpush.bf16.msrb.mxu3 %v2121_v54 }
  0xe7   :  { %1234 = vmatpush.bf16.msrb.mxu0 %v2045_v43  ;;  %1262 = vmatpush.bf16.msrb.mxu2 %v2049_v47  ;;  %v2452_v47 = vld [vmem:[%s2754_s5 + $0x30] sm:$0xff] }
  0xe8   :  { %1248 = vmatpush.bf16.msrb.mxu1 %v2109_v60  ;;  %1276 = vmatpush.bf16.msrb.mxu3 %v2113_v62 }
  0xeb   :  { %1235 = vmatpush.bf16.msrb.mxu0 %v2037_v41  ;;  %1263 = vmatpush.bf16.msrb.mxu2 %v2041_v57 }
  0xec   :  { %1249 = vmatpush.bf16.msrb.mxu1 %v2101_v11  ;;  %1277 = vmatpush.bf16.msrb.mxu3 %v2105_v15  ;;  %v2469_v11 = vld [vmem:[%s2754_s5 + $0xb8] sm:$0xff]  ;;  %v2448_v15 = vld [vmem:[%s2754_s5 + $0x10] sm:$0xff] }
  0xef   :  { %1236 = vmatpush.bf16.msrb.mxu0 %v2029_v2  ;;  %1264 = vmatpush.bf16.msrb.mxu2 %v2033_v5 }
  0xf0   :  { %1250 = vmatpush.bf16.msrb.mxu1 %v2093_v19  ;;  %1278 = vmatpush.bf16.msrb.mxu3 %v2097_v22  ;;  %v2447_v19 = vld [vmem:[%s2754_s5 + $0x8] sm:$0xff]  ;;  %v2466_v22 = vld [vmem:[%s2754_s5 + $0xa0] sm:$0xff] }
 0x12e   :  { %v455_v10 = vpop.f32.mrf.mxu0 }
 0x12f   :  { %v469_v14 = vpop.f32.mrf.mxu1  ;;  %v456_v21 = vadd.f32 %v455_v10, %v282_v13  ;;  %v2459_v10 = vld [vmem:[%s2754_s5 + $0x68] sm:$0xff] }
 0x131   :  { %v470_v27 = vadd.f32 %v469_v14, %v456_v21  ;;  %v2468_v14 = vld [vmem:[%s2754_s5 + $0xb0] sm:$0xff] }
 0x132   :  { %v2456_v21 = vld [vmem:[%s2754_s5 + $0x50] sm:$0xff] }
 0x133   :  { %v502_v32 = vmax.f32 %v470_v27, 0.0  ;;  %v2474_v27 = vld [vmem:[%s2754_s5 + $0xe0] sm:$0xff] }
 0x134   :  { %v483_v23 = vpop.f32.mrf.mxu2 }
 0x135   :  { %v497_v25 = vpop.f32.mrf.mxu3  ;;  %v484_v30 = vadd.f32 %v483_v23, %v283_v24  ;;  %v2446_v23 = vld [vmem:[%s2754_s5] sm:$0xff] }
 0x136   :  { %v457_v26 = vpop.f32.mrf.mxu0 }
 0x137   :  { %v458_v28 = vadd.f32 %v457_v26, %v282_v13  ;;  %v471_v29 = vpop.f32.mrf.mxu1  ;;  %v498_v38 = vadd.f32 %v497_v25, %v484_v30  ;;  %v2458_v13 = vld [vmem:[%s2754_s5 + $0x60] sm:$0xff]  ;;  %v2455_v25 = vld [vmem:[%s2754_s5 + $0x48] sm:$0xff]  ;;  %v2465_v26 = vld [vmem:[%s2754_s5 + $0x98] sm:$0xff] }
 0x138   :  { %v2473_v30 = vld [vmem:[%s2754_s5 + $0xd8] sm:$0xff] }
 0x139   :  { %v472_v31 = vadd.f32 %v471_v29, %v458_v28  ;;  %v503_v48 = vmax.f32 %v498_v38, 0.0  ;;  %v2454_v28 = vld [vmem:[%s2754_s5 + $0x40] sm:$0xff]  ;;  %v2464_v29 = vld [vmem:[%s2754_s5 + $0x90] sm:$0xff] }
 0x13b   :  { %v504_v34 = vmax.f32 %v472_v31, 0.0  ;;  %v2463_v31 = vld [vmem:[%s2754_s5 + $0x88] sm:$0xff] }
 0x13c   :  { %v485_v35 = vpop.f32.mrf.mxu2 }
 0x13d   :  { %v506_v39 = vpack.c.bf16 %v504_v34, %v502_v32  ;;  %v486_v33 = vadd.f32 %v485_v35, %v283_v24  ;;  %v499_v40 = vpop.f32.mrf.mxu3  ;;  %v2475_v24 = vld [vmem:[%s2754_s5 + $0xe8] sm:$0xff]  ;;  %v2472_v34 = vld [vmem:[%s2754_s5 + $0xd0] sm:$0xff]  ;;  %v2462_v35 = vld [vmem:[%s2754_s5 + $0x80] sm:$0xff] }
 0x13e   :  { %v716_v42 = vpop.f32.mrf.mxu0 }
 0x13f   :  { %v500_v43 = vadd.f32 %v499_v40, %v486_v33  ;;  %v730_v44 = vpop.f32.mrf.mxu1  ;;  %976 = vmatmul.bf16.vlgmr.msra.gmra.mxu0 %v506_v39  ;;  %1004 = vmatmul.bf16.vlgmr.msra.gmra.mxu2 %v506_v39  ;;  %v717_v53 = vadd.f32 %v716_v42, %v543_v36  ;;  %v804_v33 = vperm.slane %v802_v37, 0  ;;  %v2470_v42 = vld [vmem:[%s2754_s5 + $0xc0] sm:$0xff] }
 0x140   :  { %1576 = vmatpush.bf16.msra.mxu2 %v2453_v3  ;;  %1452 = vmatpush.bf16.msra.mxu0 %v2469_v11  ;;  %v2471_v3 = vld [vmem:[%s2754_s5 + $0xc8] sm:$0xff] }
 0x141   :  { %v505_v50 = vmax.f32 %v500_v43, 0.0  ;;  %v731_v56 = vadd.f32 %v730_v44, %v717_v53 }
 0x143   :  { %v507_v52 = vpack.c.bf16 %v505_v50, %v503_v48  ;;  %v763_v60 = vmax.f32 %v731_v56, 0.0 }
 0x144   :  { %v744_v54 = vpop.f32.mrf.mxu2  ;;  %1577 = vmatpush.bf16.msra.mxu2 %v2452_v47  ;;  %1453 = vmatpush.bf16.msra.mxu0 %v2468_v14  ;;  %v805_v47 = vperm.slane %v802_v37, 1 }
 0x145   :  { %v758_v49 = vpop.f32.mrf.mxu3  ;;  %990 = vmatmul.bf16.vlgmr.msra.gmra.mxu1 %v507_v52  ;;  %1018 = vmatmul.bf16.vlgmr.msra.gmra.mxu3 %v507_v52  ;;  %v745_v59 = vadd.f32 %v744_v54, %v544_v9 }
 0x146   :  { %v718_v41 = vpop.f32.mrf.mxu0  ;;  %1590 = vmatpush.bf16.msra.mxu3 %v2461_v51  ;;  %1466 = vmatpush.bf16.msra.mxu1 %v2477_v16 }
 0x147   :  { %v719_v57 = vadd.f32 %v718_v41, %v543_v36  ;;  %v732_v58 = vpop.f32.mrf.mxu1  ;;  %v759_v63 = vadd.f32 %v758_v49, %v745_v59 }
 0x148   :  { %1578 = vmatpush.bf16.msra.mxu2 %v2451_v55  ;;  %1454 = vmatpush.bf16.msra.mxu0 %v2467_v18 }
 0x149   :  { %v733_v45 = vadd.f32 %v732_v58, %v719_v57  ;;  %v764_v4 = vmax.f32 %v759_v63, 0.0  ;;  %v1063_v57 = vld [vmem:[%s2755_s6 + $0xa] sm:$0x3] }
 0x14a   :  { %1591 = vmatpush.bf16.msra.mxu3 %v2460_v7  ;;  %1467 = vmatpush.bf16.msra.mxu1 %v2476_v20 }
 0x14b   :  { %v765_v61 = vmax.f32 %v733_v45, 0.0 }
 0x14c   :  { %v746_v62 = vpop.f32.mrf.mxu2  ;;  %1579 = vmatpush.bf16.msra.mxu2 %v2450_v8  ;;  %1455 = vmatpush.bf16.msra.mxu0 %v2466_v22 }
 0x14d   :  { %v767_v46 = vpack.c.bf16 %v765_v61, %v763_v60  ;;  %v747_v0 = vadd.f32 %v746_v62, %v544_v9  ;;  %v760_v1 = vpop.f32.mrf.mxu3  ;;  %v1065_v62 = vperm.slane %v1063_v57, 0 }
 0x14e   :  { %1592 = vmatpush.bf16.msra.mxu3 %v2459_v10  ;;  %1468 = vmatpush.bf16.msra.mxu1 %v2475_v24 }
 0x14f   :  { %v761_v2 = vadd.f32 %v760_v1, %v747_v0  ;;  %1237 = vmatmul.bf16.vlgmr.msrb.gmra.mxu0 %v767_v46  ;;  %1265 = vmatmul.bf16.vlgmr.msrb.gmra.mxu2 %v767_v46 }
 0x150   :  { %1580 = vmatpush.bf16.msra.mxu2 %v2449_v12  ;;  %1456 = vmatpush.bf16.msra.mxu0 %v2465_v26 }
 0x151   :  { %v766_v5 = vmax.f32 %v761_v2, 0.0 }
 0x152   :  { %1593 = vmatpush.bf16.msra.mxu3 %v2458_v13  ;;  %1469 = vmatpush.bf16.msra.mxu1 %v2474_v27 }
 0x153   :  { %v768_v6 = vpack.c.bf16 %v766_v5, %v764_v4  ;;  %v1066_v5 = vperm.slane %v1063_v57, 1 }
 0x154   :  { %1581 = vmatpush.bf16.msra.mxu2 %v2448_v15  ;;  %1457 = vmatpush.bf16.msra.mxu0 %v2464_v29 }
 0x155   :  { %1251 = vmatmul.bf16.vlgmr.msrb.gmra.mxu1 %v768_v6  ;;  %1279 = vmatmul.bf16.vlgmr.msrb.gmra.mxu3 %v768_v6 }
 0x156   :  { %1594 = vmatpush.bf16.msra.mxu3 %v2457_v17  ;;  %1470 = vmatpush.bf16.msra.mxu1 %v2473_v30 }
 0x158   :  { %1582 = vmatpush.bf16.msra.mxu2 %v2447_v19  ;;  %1458 = vmatpush.bf16.msra.mxu0 %v2463_v31 }
 0x15a   :  { %1595 = vmatpush.bf16.msra.mxu3 %v2456_v21  ;;  %1471 = vmatpush.bf16.msra.mxu1 %v2472_v34 }
 0x15c   :  { %1583 = vmatpush.bf16.msra.mxu2 %v2446_v23  ;;  %1459 = vmatpush.bf16.msra.mxu0 %v2462_v35 }
 0x15e   :  { %1596 = vmatpush.bf16.msra.mxu3 %v2455_v25  ;;  %1472 = vmatpush.bf16.msra.mxu1 %v2471_v3 }
 0x162   :  { %1597 = vmatpush.bf16.msra.mxu3 %v2454_v28  ;;  %1473 = vmatpush.bf16.msra.mxu1 %v2470_v42  ;;  %v2481_v28 = vld [vmem:[%s2755_s6 + $0xc] ss:$0 sm:$0xff] }
 0x1bc   :  { %v977_v32 = vpop.f32.mrf.mxu0 }
 0x1bd   :  { %v978_v43 = vadd.f32 %v977_v32, %v804_v33 }
 0x1c2   :  { %v991_v38 = vpop.f32.mrf.mxu1  ;;  %v1005_v39 = vpop.f32.mrf.mxu2 }
 0x1c3   :  { %v992_v44 = vadd.f32 %v991_v38, %v978_v43  ;;  %v1006_v55 = vadd.f32 %v1005_v39, %v805_v47 }
 0x1c4   :  { %v979_v40 = vpop.f32.mrf.mxu0 }
 0x1c5   :  { %v980_v48 = vadd.f32 %v979_v40, %v804_v33  ;;  %v1024_v54 = vmax.f32 %v992_v44, 0.0 }
 0x1c8   :  { %v1019_v36 = vpop.f32.mrf.mxu3 }
 0x1c9   :  { %v1020_v49 = vadd.f32 %v1019_v36, %v1006_v55 }
 0x1ca   :  { %v993_v50 = vpop.f32.mrf.mxu1  ;;  %v1007_v51 = vpop.f32.mrf.mxu2 }
 0x1cb   :  { %v994_v52 = vadd.f32 %v993_v50, %v980_v48  ;;  %v1008_v56 = vadd.f32 %v1007_v51, %v805_v47  ;;  %v1025_v61 = vmax.f32 %v1020_v49, 0.0 }
 0x1cc   :  { %v1238_v53 = vpop.f32.mrf.mxu0 }
 0x1cd   :  { %v1026_v9 = vmax.f32 %v994_v52, 0.0  ;;  %v1239_v1 = vadd.f32 %v1238_v53, %v1065_v62 }
 0x1cf   :  { %v1028_v41 = vpack.c.bf16 %v1026_v9, %v1024_v54 }
 0x1d0   :  { %v1021_v58 = vpop.f32.mrf.mxu3 }
 0x1d1   :  { %v1022_v59 = vadd.f32 %v1021_v58, %v1008_v56  ;;  %1584 = vmatmul.bf16.vlgmr.msra.gmra.mxu2 %v1028_v41 }
 0x1d2   :  { %v1252_v45 = vpop.f32.mrf.mxu1  ;;  %v1266_v60 = vpop.f32.mrf.mxu2 }
 0x1d3   :  { %v1027_v63 = vmax.f32 %v1022_v59, 0.0  ;;  %v1253_v4 = vadd.f32 %v1252_v45, %v1239_v1  ;;  %v1267_v12 = vadd.f32 %v1266_v60, %v1066_v5 }
 0x1d4   :  { %v1240_v0 = vpop.f32.mrf.mxu0 }
 0x1d5   :  { %v1029_v46 = vpack.c.bf16 %v1027_v63, %v1025_v61  ;;  %v1241_v6 = vadd.f32 %v1240_v0, %v1065_v62  ;;  %v1285_v11 = vmax.f32 %v1253_v4, 0.0 }
 0x1d7   :  { %1598 = vmatmul.bf16.vlgmr.msra.gmra.mxu3 %v1029_v46 }
 0x1d8   :  { %v1280_v2 = vpop.f32.mrf.mxu3 }
 0x1d9   :  { %v1281_v14 = vadd.f32 %v1280_v2, %v1267_v12 }
 0x1da   :  { %v1254_v7 = vpop.f32.mrf.mxu1  ;;  %v1268_v10 = vpop.f32.mrf.mxu2 }
 0x1db   :  { %v1255_v8 = vadd.f32 %v1254_v7, %v1241_v6  ;;  %v1269_v16 = vadd.f32 %v1268_v10, %v1066_v5  ;;  %v1286_v19 = vmax.f32 %v1281_v14, 0.0 }
 0x1dd   :  { %v1287_v13 = vmax.f32 %v1255_v8, 0.0 }
 0x1df   :  { %v1289_v15 = vpack.c.bf16 %v1287_v13, %v1285_v11 }
 0x1e0   :  { %v1282_v17 = vpop.f32.mrf.mxu3 }
 0x1e1   :  { %v1283_v18 = vadd.f32 %v1282_v17, %v1269_v16  ;;  %1460 = vmatmul.bf16.vlgmr.msra.gmra.mxu0 %v1289_v15 }
 0x1e3   :  { %v1288_v20 = vmax.f32 %v1283_v18, 0.0 }
 0x1e5   :  { %v1290_v21 = vpack.c.bf16 %v1288_v20, %v1286_v19 }
 0x1e7   :  { %1474 = vmatmul.bf16.vlgmr.msra.gmra.mxu1 %v1290_v21 }
 0x254   :  { %v1585_v23 = vpop.f32.mrf.mxu2 }
 0x25a   :  { %v1599_v26 = vpop.f32.mrf.mxu3 }
 0x25c   :  { %v1587_v35 = vpop.f32.mrf.mxu2 }
 0x25e   :  { %v1461_v22 = vpop.f32.mrf.mxu0 }
 0x262   :  { %v1601_v3 = vpop.f32.mrf.mxu3 }
 0x264   :  { %v1475_v24 = vpop.f32.mrf.mxu1 }
 0x265   :  { %v1476_v25 = vadd.f32 %v1475_v24, %v1461_v22 }
 0x266   :  { %v1463_v31 = vpop.f32.mrf.mxu0 }
 0x267   :  { %v1586_v27 = vadd.f32 %v1585_v23, %v1476_v25 }
 0x269   :  { %v1600_v29 = vadd.f32 %v1599_v26, %v1586_v27 }
 0x26b   :  { %v1608_v30 = vadd.f32 %v2481_v28, %v1600_v29 }
 0x26c   :  { %v1477_v32 = vpop.f32.mrf.mxu1 }
 0x26d   :  { %1611 = vst.msk [vmem:[%s2756_s7] sm:$0xff] %vm1610_vm4, %v1608_v30  ;;  %v1478_v34 = vadd.f32 %v1477_v32, %v1463_v31 }
 0x26f   :  { %v1588_v37 = vadd.f32 %v1587_v35, %v1478_v34 }
 0x271   :  { %v1602_v38 = vadd.f32 %v1601_v3, %v1588_v37 }
 0x273   :  { %v1609_v39 = vadd.f32 %v2481_v28, %v1602_v38 }
 0x275   :  { %1612 = vst.msk [vmem:[%s2756_s7 + $0x8] sm:$0xff] %vm1610_vm4, %v1609_v39 }
 0x276   :  { %1617 = vsyncpa [#allocation3], 1 }

</bundles_post_ra>
